<compile_context>
chip_gen: v5e
topology: v5e:2x2
jax: 0.10.0
libtpu: 0.0.40
codegen_flags: <defaults>
</compile_context>

<pallas_src>
import functools
import math

import jax
import jax.numpy as jnp
from jax.experimental import pallas as pl
from jax.experimental.pallas import tpu as pltpu

QUANT_FACTOR = 0.1


def _round_up(x, m):
    return ((x + m - 1) // m) * m


def _time_encoding_kernel(t_ref, wr_ref, br_ref, we_ref, be_ref, out_ref, *,
                          rd, pack):
    # t_ref: (tile_n, pack) raw timestamps.  Quantize on the narrow block
    # (rd-times cheaper than post-replication).  Keep the divide (not *10.0)
    # for bit-parity with torch.floor(t / q) at quantization boundaries.
    t_q = jnp.floor(t_ref[...] / QUANT_FACTOR) * QUANT_FACTOR      # (tile_n, pack)

    # In-kernel replication to the stage-1 lane layout c = j*pack + p:
    # a lane concatenate of `rd` copies (pack > 1), or plain broadcasting against
    # the (1, rd) weight row (pack == 1).  Pure VPU/XLU -- never the MXU, so the
    # cos argument stays exact f32.
    if pack > 1:
        t_rep = jnp.concatenate([t_q] * rd, axis=1)                # (tile_n, rd*pack)
    else:
        t_rep = t_q                                                # (tile_n, 1) broadcasts

    z = t_rep * wr_ref[...] + br_ref[...]                          # (tile_n, rd*pack)
    reduced = jnp.maximum(jnp.cos(z), 0.0)                         # relu(cos(.))

    # Stage 2 on the MXU: (tile_n, rd*pack) @ (rd*pack, pack*dim_pad).
    # K = 128 when pack = 128//rd; output block is lane-dense.
    enc = jnp.dot(
        reduced,
        we_ref[...],
        preferred_element_type=jnp.float32,
        precision=jax.lax.Precision.HIGHEST,
    )
    out_ref[...] = (enc + be_ref[...]).astype(out_ref.dtype)


def memory_efficient_time_encoding(t, w_reduce_weight, w_reduce_bias,
                                   w_expand_weight, w_expand_bias,
                                   *, tile_rows=2048):
    """Forward pass of MemoryEfficientTimeEncoding.

    Args:
      t:               (B,) or (B, 1) timestamps.
      w_reduce_weight: (rd, 1)   -- nn.Linear(1, rd).weight layout.
      w_reduce_bias:   (rd,)
      w_expand_weight: (dim, rd) -- nn.Linear(rd, dim).weight layout.
      w_expand_bias:   (dim,)
      tile_rows: packed rows per grid step (tile_rows * P batch elements).
    Returns:
      (B, dim) float32 encoding.
    """
    t = jnp.asarray(t, jnp.float32)
    if t.ndim == 2:
        t = t[:, 0]
    B = t.shape[0]
    rd = w_reduce_weight.shape[0]
    dim = w_expand_weight.shape[0]
    if B == 0:
        return jnp.zeros((0, dim), jnp.float32)

    # ---- packing geometry -------------------------------------------------
    # P batch rows share one packed output row.  P = 128 // rd makes stage-1
    # lane width exactly 128 (dense loads, MXU K = 128).  Fall back to P = 1
    # for wide encodings (dim >= 128 -> rd >= 32, output already lane-heavy).
    if dim >= 128 or rd >= 128:
        P = 1
        dim_pad = dim                     # no dummy output columns for wide dims
    else:
        P = max(1, 128 // rd)
        # Pad dim so P*dim_pad is a multiple of 128 -> unmasked lane-dense stores.
        step = 128 // math.gcd(P, 128)
        dim_pad = _round_up(dim, step)
    lane_dim = P * dim_pad
    k_dim = P * rd

    f32 = jnp.float32
    wr_vec = w_reduce_weight.reshape(rd).astype(f32)               # in_features == 1
    # Stage-1 lane layout c = j*P + p  ->  weight/bias repeated per element.
    wr_lane = jnp.repeat(wr_vec, P).reshape(1, k_dim)
    br_lane = jnp.repeat(w_reduce_bias.astype(f32), P).reshape(1, k_dim)
    # Block-structured expand weight: we_block[j*P + p, q*dim_pad + d] = We[d, j] * (p == q).
    we_t = w_expand_weight.T.astype(f32)                           # (rd, dim)
    we_t_pad = jnp.pad(we_t, ((0, 0), (0, dim_pad - dim)))         # (rd, dim_pad)
    we_block = jnp.einsum('jd,pq->jpqd', we_t_pad, jnp.eye(P, dtype=f32))
    we_block = we_block.reshape(k_dim, lane_dim)
    be_pad = jnp.pad(w_expand_bias.astype(f32), (0, dim_pad - dim))
    be_lane = jnp.tile(be_pad, P).reshape(1, lane_dim)

    # ---- tile / grid selection (bounded padding, >=2 steps when possible) --
    n_rows = pl.cdiv(B, P)                      # packed rows needed
    n_rows8 = _round_up(n_rows, 8)              # minimal 8-aligned row count

    # Cap the tile so double-buffered streamed blocks stay well under the
    # v7x 32 MiB scoped-VMEM default (re-derived for the smallest chip).
    row_bytes = 2 * (P + lane_dim) * 4
    max_tile_n = max(8, ((16 * 1024 * 1024) // row_bytes) // 8 * 8)
    tile_cap = min(max(8, _round_up(tile_rows, 8)), max_tile_n)

    g = pl.cdiv(n_rows8, tile_cap)
    if g < 2 and n_rows8 >= 16:
        g = 2                                   # keep both v7x TensorCores busy
    tile_n = _round_up(pl.cdiv(n_rows8, g), 8)  # pad bounded by ~one 8-row group/step
    g = pl.cdiv(n_rows8, tile_n)
    n_rows_pad = g * tile_n
    b_pad = n_rows_pad * P

    t_padded = jnp.pad(t, (0, b_pad - B))
    t_pack = t_padded.reshape(n_rows_pad, P)    # row r, slot p  <->  batch r*P + p

    resident = lambda shape: pl.BlockSpec(shape, lambda i: (0, 0))  # fetched once

    cost = pl.CostEstimate(
        flops=2 * n_rows_pad * k_dim * lane_dim + 6 * n_rows_pad * k_dim,
        transcendentals=n_rows_pad * k_dim,
        bytes_accessed=4 * (n_rows_pad * P + n_rows_pad * lane_dim
                            + k_dim * lane_dim + 2 * k_dim + lane_dim),
    )

    out_packed = pl.pallas_call(
        functools.partial(_time_encoding_kernel, rd=rd, pack=P),
        out_shape=jax.ShapeDtypeStruct((n_rows_pad, lane_dim), jnp.float32),
        grid=(g,),
        in_specs=[
            pl.BlockSpec((tile_n, P), lambda i: (i, 0)),   # streamed raw timestamps
            resident((1, k_dim)),                          # wr (lane-repeated)
            resident((1, k_dim)),                          # br (lane-repeated)
            resident((k_dim, lane_dim)),                   # We block-structured
            resident((1, lane_dim)),                       # be (lane-tiled)
        ],
        out_specs=pl.BlockSpec((tile_n, lane_dim), lambda i: (i, 0)),
        compiler_params=pltpu.CompilerParams(
            dimension_semantics=("parallel",),   # shard batch across 2 TCs on v7x
            # tile_n<=2048, lane_dim=512 -> ~9 MiB double-buffered: safe on
            # v5e/v6e (128 MiB) and v7x (64 MiB physical / 32 MiB scoped).
            vmem_limit_bytes=32 * 1024 * 1024,
        ),
        cost_estimate=cost,
    )(t_pack, wr_lane, br_lane, we_block, be_lane)

    # Undo the lane packing: (n_rows_pad, P*dim_pad) -> (b_pad, dim_pad) is a free
    # contiguous row-major reshape; slice only when padding was actually added
    # (no-op, hence no extra HBM copy, for cleanly dividing batch sizes / dims).
    out = out_packed.reshape(b_pad, dim_pad)
    if b_pad != B or dim_pad != dim:
        out = out[:B, :dim]
    return out


def reference_jax(t, w_reduce_weight, w_reduce_bias, w_expand_weight, w_expand_bias):
    """Plain-JAX, fully element-wise f32 reference of the forward semantics."""
    t = jnp.asarray(t, jnp.float32)
    if t.ndim == 1:
        t = t[:, None]
    rd = w_reduce_weight.shape[0]
    t_q = jnp.floor(t / QUANT_FACTOR) * QUANT_FACTOR
    z = t_q * w_reduce_weight.reshape(1, rd) + w_reduce_bias.reshape(1, rd)
    reduced = jnp.maximum(jnp.cos(z), 0.0)
    # (B, rd) x (dim, rd) -> (B, dim), done element-wise to avoid any MXU
    # precision ambiguity in the reference itself.
    enc = (reduced[:, None, :] * w_expand_weight[None, :, :]).sum(-1)
    return enc + w_expand_bias[None, :]


def _xavier_uniform(key, shape):
    # shape = (out_features, in_features) like torch Linear.weight
    fan_out, fan_in = shape
    bound = jnp.sqrt(6.0 / (fan_in + fan_out))
    return jax.random.uniform(key, shape, jnp.float32, -bound, bound)


if __name__ == "__main__":
    dimension = 32
    reduced_dim = max(8, dimension // 4)   # = 8
    batch = 8

    key = jax.random.PRNGKey(0)
    k_t, k_wr, k_we = jax.random.split(key, 3)

    # Deterministic parameter init (matches module __init__ shapes / init scheme).
    wr_weight = _xavier_uniform(k_wr, (reduced_dim, 1))          # nn.Linear(1, rd).weight
    wr_bias = jnp.zeros((reduced_dim,), jnp.float32)             # zeros_
    we_weight = _xavier_uniform(k_we, (dimension, reduced_dim))  # nn.Linear(rd, dim).weight
    we_bias = jnp.zeros((dimension,), jnp.float32)               # zeros_

    # Example timestamps.
    t = jax.random.uniform(k_t, (batch,), jnp.float32, 0.0, 100.0)

    out = memory_efficient_time_encoding(t, wr_weight, wr_bias, we_weight, we_bias)
    out = jax.block_until_ready(out)

    ref = reference_jax(t, wr_weight, wr_bias, we_weight, we_bias)
    assert out.shape == (batch, dimension), out.shape
    assert out.dtype == jnp.float32, out.dtype
    max_err = float(jnp.max(jnp.abs(out - ref)))
    # HIGHEST-precision f32 matmul + exact-f32 stage 1 -> errors are ~1e-6;
    # 2e-3 leaves headroom for MXU pass-count differences across generations.
    assert jnp.allclose(out, ref, atol=2e-3, rtol=2e-3), max_err

    # TODO(synk): the module's Python dict cache / hit-rate logging is host-side
    # bookkeeping with no tensor semantics; it is intentionally not reproduced.
    print("KERNEL_OK")
</pallas_src>

<mosaic_0001>
module attributes {stable_mosaic.version = 11 : i64} {
  func.func @_time_encoding_kernel(%arg0: i32, %arg1: memref<8x16xf32, #tpu.memory_space<vmem>>, %arg2: memref<1x128xf32, #tpu.memory_space<vmem>>, %arg3: memref<1x128xf32, #tpu.memory_space<vmem>>, %arg4: memref<128x512xf32, #tpu.memory_space<vmem>>, %arg5: memref<1x512xf32, #tpu.memory_space<vmem>>, %arg6: memref<8x512xf32, #tpu.memory_space<vmem>>) attributes {dimension_semantics = [#tpu.dimension_semantics<parallel>], iteration_bounds = array<i64: 1>, scalar_prefetch = 0 : i64, scratch_operands = 0 : i64, tpu.core_type = #tpu.core_type<tc>, window_params = [{transform_indices = @transform_0, window_bounds = array<i64: 8, 16>}, {pipeline_mode = #tpu.pipeline_mode<synchronous>, transform_indices = @transform_1, window_bounds = array<i64: 1, 128>}, {pipeline_mode = #tpu.pipeline_mode<synchronous>, transform_indices = @transform_2, window_bounds = array<i64: 1, 128>}, {pipeline_mode = #tpu.pipeline_mode<synchronous>, transform_indices = @transform_3, window_bounds = array<i64: 128, 512>}, {pipeline_mode = #tpu.pipeline_mode<synchronous>, transform_indices = @transform_4, window_bounds = array<i64: 1, 512>}, {transform_indices = @transform_5, window_bounds = array<i64: 8, 512>}]} {
    %c0 = arith.constant 0 : index
    %c0_0 = arith.constant 0 : index
    %0 = vector.load %arg1[%c0, %c0_0] : memref<8x16xf32, #tpu.memory_space<vmem>>, vector<8x16xf32>
    %cst = arith.constant 1.000000e-01 : f32
    %1 = vector.broadcast %cst : f32 to vector<8x16xf32>
    %2 = arith.divf %0, %1 : vector<8x16xf32>
    %3 = math.floor %2 : vector<8x16xf32>
    %cst_1 = arith.constant 1.000000e-01 : f32
    %4 = vector.broadcast %cst_1 : f32 to vector<8x16xf32>
    %5 = arith.mulf %3, %4 : vector<8x16xf32>
    %6 = tpu.concatenate %5, %5, %5, %5, %5, %5, %5, %5 in 1 : vector<8x16xf32>, vector<8x16xf32>, vector<8x16xf32>, vector<8x16xf32>, vector<8x16xf32>, vector<8x16xf32>, vector<8x16xf32>, vector<8x16xf32> -> vector<8x128xf32>
    %c0_2 = arith.constant 0 : index
    %c0_3 = arith.constant 0 : index
    %7 = vector.load %arg2[%c0_2, %c0_3] : memref<1x128xf32, #tpu.memory_space<vmem>>, vector<1x128xf32>
    %8 = vector.broadcast %7 : vector<1x128xf32> to vector<8x128xf32>
    %9 = arith.mulf %6, %8 : vector<8x128xf32>
    %c0_4 = arith.constant 0 : index
    %c0_5 = arith.constant 0 : index
    %10 = vector.load %arg3[%c0_4, %c0_5] : memref<1x128xf32, #tpu.memory_space<vmem>>, vector<1x128xf32>
    %11 = vector.broadcast %10 : vector<1x128xf32> to vector<8x128xf32>
    %12 = arith.addf %9, %11 : vector<8x128xf32>
    %13 = math.cos %12 : vector<8x128xf32>
    %cst_6 = arith.constant 0.000000e+00 : f32
    %14 = vector.broadcast %cst_6 : f32 to vector<8x128xf32>
    %15 = arith.maximumf %13, %14 : vector<8x128xf32>
    %c0_7 = arith.constant 0 : index
    %c0_8 = arith.constant 0 : index
    %16 = vector.load %arg4[%c0_7, %c0_8] : memref<128x512xf32, #tpu.memory_space<vmem>>, vector<128x512xf32>
    %cst_9 = arith.constant dense<0.000000e+00> : vector<8x512xf32>
    %17 = tpu.matmul %15, %16, %cst_9 {dimension_numbers = #tpu.dot_dimension_numbers<[1], [0], [0], [1], [0, 0, 1, 1], [], []>, precision = #tpu.contract_precision<fp32>} : vector<8x128xf32>, vector<128x512xf32>, vector<8x512xf32> -> vector<8x512xf32>
    %c0_10 = arith.constant 0 : index
    %c0_11 = arith.constant 0 : index
    %18 = vector.load %arg5[%c0_10, %c0_11] : memref<1x512xf32, #tpu.memory_space<vmem>>, vector<1x512xf32>
    %19 = vector.broadcast %18 : vector<1x512xf32> to vector<8x512xf32>
    %20 = arith.addf %17, %19 : vector<8x512xf32>
    %c0_12 = arith.constant 0 : index
    %c0_13 = arith.constant 0 : index
    %21 = vector.load %arg6[%c0_12, %c0_13] : memref<8x512xf32, #tpu.memory_space<vmem>>, vector<8x512xf32>
    tpu.vector_store %arg6[%c0_12, %c0_13], %20 {strides = array<i32>} : memref<8x512xf32, #tpu.memory_space<vmem>>, vector<8x512xf32>,
    return
  }
  func.func @transform_0(%arg0: i32) -> (i32, i32) {
    %c0_i32 = arith.constant 0 : i32
    %c0_i32_0 = arith.constant 0 : i32
    return %arg0, %c0_i32 : i32, i32
  }
  func.func @transform_1(%arg0: i32) -> (i32, i32) {
    %c0_i32 = arith.constant 0 : i32
    %c0_i32_0 = arith.constant 0 : i32
    %c0_i32_1 = arith.constant 0 : i32
    return %c0_i32, %c0_i32_0 : i32, i32
  }
  func.func @transform_2(%arg0: i32) -> (i32, i32) {
    %c0_i32 = arith.constant 0 : i32
    %c0_i32_0 = arith.constant 0 : i32
    %c0_i32_1 = arith.constant 0 : i32
    return %c0_i32, %c0_i32_0 : i32, i32
  }
  func.func @transform_3(%arg0: i32) -> (i32, i32) {
    %c0_i32 = arith.constant 0 : i32
    %c0_i32_0 = arith.constant 0 : i32
    %c0_i32_1 = arith.constant 0 : i32
    return %c0_i32, %c0_i32_0 : i32, i32
  }
  func.func @transform_4(%arg0: i32) -> (i32, i32) {
    %c0_i32 = arith.constant 0 : i32
    %c0_i32_0 = arith.constant 0 : i32
    %c0_i32_1 = arith.constant 0 : i32
    return %c0_i32, %c0_i32_0 : i32, i32
  }
  func.func @transform_5(%arg0: i32) -> (i32, i32) {
    %c0_i32 = arith.constant 0 : i32
    %c0_i32_0 = arith.constant 0 : i32
    return %arg0, %c0_i32 : i32, i32
  }
}

</mosaic_0001>

<bundles_post_ra>
// kernel: tpu_custom_call.1
= control target key start
LH: loop header
LB: loop body
LE: loop exit
PB: predicated region body
PF: predicated region fallthrough
CT: control target
= control target key end

     0   :  { %10 = vsyncpa [#allocation3], 0  ;;  %s3081_s0 = inlined_call_operand.hbm [shape: f32[8,16], index: 0, kind: input, shape index: {}]   ;;  %s3082_s1 = inlined_call_operand.hbm [shape: f32[1,128], index: 1, kind: input, shape index: {}]   ;;  %s3083_s2 = inlined_call_operand.vmem [shape: f32[1,128], index: 2, kind: input, shape index: {}]   ;;  %s3084_s3 = inlined_call_operand.hbm [shape: f32[128,512], index: 3, kind: input, shape index: {}]   ;;  %s3085_s4 = inlined_call_operand.hbm [shape: f32[1,512], index: 4, kind: input, shape index: {}]   ;;  %s3086_s5 = inlined_call_operand.hbm [shape: f32[8,512], index: 5, kind: output, shape index: {}]  }
   0x1   :  { %11 = vsyncpa [#allocation6], 0 }
   0x2   :  { %12 = vsyncpa [#allocation9], 0  ;;  %s30_s20 = sshll.u32 %s3082_s1, 4  ;;  %s31_s20 = int_to_ptr.hbm [resolvable:$true] %s30_s20 }
   0x3   :  { %13 = vsyncpa [#allocation4], 0  ;;  %s1907_s21 = smov [#allocation5]   ;;  %s19_s25 = sshll.u32 %s3081_s0, 4  ;;  %s20_s25 = int_to_ptr.hbm [resolvable:$true] %s19_s25 }
   0x4   :  { %s32_s22 = sshll.u32 %s1907_s21, 4  ;;  %s1908_s26 = smov [#allocation2]   ;;  %s33_s22 = int_to_ptr.vmem [resolvable:$true] %s32_s22 }
   0x5   :  { %35 = dma.hbm_to_vmem [thread:$0]  %s31_s20, 16, %s33_s22, [#allocation6]  }
   0x6   :  { %s21_s27 = sshll.u32 %s1908_s26, 4  ;;  %s42_s30 = sshll.u32 %s3084_s3, 4  ;;  %s22_s27 = int_to_ptr.vmem [resolvable:$true] %s21_s27  ;;  %s43_s30 = int_to_ptr.hbm [resolvable:$true] %s42_s30 }
   0x7   :  { %24 = dma.hbm_to_vmem [thread:$0]  %s20_s25, 128, %s22_s27, [#allocation3]  }
   0x8   :  { %s1909_s1 = smov [#allocation7]   ;;  %s56_s9 = sshll.u32 %s3085_s4, 4  ;;  %s57_s9 = int_to_ptr.hbm [resolvable:$true] %s56_s9 }
   0x9   :  { %s44_s6 = sshll.u32 %s1909_s1, 4  ;;  %s1910_s10 = smov 512   ;;  %s45_s6 = int_to_ptr.vmem [resolvable:$true] %s44_s6 }
   0xa   :  { %s1911_s0 = smov 32   ;;  %s1912_s11 = smov [#allocation8]  }
   0xb   :  { %50 = dma.hbm_to_vmem [thread:$0]  %s43_s30, 8192, %s45_s6, [#allocation6], %s1910_s10, %s1910_s10, %s1911_s0  }
   0xc   :  { %s58_s12 = sshll.u32 %s1912_s11, 4  ;;  %s59_s12 = int_to_ptr.vmem [resolvable:$true] %s58_s12 }
   0xd   :  { %61 = dma.hbm_to_vmem [thread:$0]  %s57_s9, 64, %s59_s12, [#allocation9]  }
   0xe   :  { %1899 = dma.done.wait [#allocation3], 128  }
   0xf   :  { %1900 = vsyncadd [#allocation3], 4294967168 }
  0x10   :  { %1901 = dma.done.wait [#allocation6], 8208  }
  0x11   :  { %1902 = vsyncadd [#allocation6], 4294959088 }
  0x12   :  { %1903 = dma.done.wait [#allocation9], 64  }
  0x13   :  { %1904 = vsyncadd [#allocation9], 4294967232  ;;  %v1913_v0 = vmov 0.1   ;;  %v78_v5 = vld [vmem:[#allocation2] sm:$0xff]  ;;  %s1914_s3 = smov 16  }
  0x14   :  { %1777 = vrcp.f32 %v1913_v0  ;;  %s1915_s4 = smov 48   ;;  %s1916_s13 = smov 80   ;;  %vm111_vm1 = vcmask 130048   ;;  %vm113_vm2 = vcmask 261120   ;;  %vm115_vm3 = vcmask 392192   ;;  %v350_v29 = vld [vmem:[#allocation7 + $0x1e0] sm:$0xff] }
  0x15   :  { %s1917_s14 = smov 64   ;;  %s1918_s15 = smov 96   ;;  %vm117_vm4 = vcmask 523264   ;;  %vm119_vm5 = vcmask 654336   ;;  %vm121_vm6 = vcmask 785408   ;;  %vm123_vm7 = vcmask 916480  }
  0x16   :  { %s1919_s16 = smov 112   ;;  %v1775_v22 = vld [vmem:[#allocation5] ss:$0 sm:$0xff]  ;;  %v1776_v24 = vld [vmem:[%s3083_s2] ss:$0 sm:$0xff]  ;;  %v1977_v30 = vand.u32 4294901760, %v350_v29 }
  0x17   :  { %v346_v33 = vld [vmem:[#allocation7 + $0x1c0] sm:$0xff]  ;;  %s1927_s2 = smov [#allocation10]   ;;  %s1739_s22 = sshll.u32 %s3086_s5, 4  ;;  %s1740_s22 = int_to_ptr.hbm [resolvable:$true] %s1739_s22 }
  0x18   :  { %v1982_v34 = vsub.f32 %v350_v29, %v1977_v30  ;;  %v1984_v35 = vand.u32 4294901760, %v346_v33  ;;  %561 = vmatpush.msra.mxu3 %v1977_v30  ;;  %365 = vmatpush.msra.mxu0 %v1977_v30  ;;  %v342_v38 = vld [vmem:[#allocation7 + $0x1a0] sm:$0xff]  ;;  %s1737_s19 = sshll.u32 %s1927_s2, 4  ;;  %s1738_s19 = int_to_ptr.vmem [resolvable:$true] %s1737_s19 }
  0x19   :  { %v1995_v41 = vand.u32 4294901760, %v342_v38  ;;  %v338_v44 = vld [vmem:[#allocation7 + $0x180] sm:$0xff] }
  0x1a   :  { %v1778_v1 = vpop.eup %1777  ;;  %v407_v39 = vand.u32 4294901760, %v1982_v34  ;;  %v1992_v40 = vsub.f32 %v346_v33, %v1984_v35  ;;  %508 = vmatpush.msra.mxu2 %v1982_v34  ;;  %563 = vmatpush.msra.mxu3 %v1984_v35  ;;  %v2007_v48 = vand.u32 4294901760, %v338_v44  ;;  %v334_v51 = vld [vmem:[#allocation7 + $0x160] sm:$0xff] }
  0x1b   :  { %v80_v2 = vmul.f32 0.1, %v1778_v1  ;;  %vm84_vm0 = vweird.f32 %v1778_v1  ;;  %367 = vmatpush.msra.mxu0 %v1984_v35  ;;  %v2004_v47 = vsub.f32 %v342_v38, %v1995_v41  ;;  %v2022_v56 = vand.u32 4294901760, %v334_v51  ;;  %v330_v57 = vld [vmem:[#allocation7 + $0x140] sm:$0xff] }
  0x1c   :  { %v408_v45 = vsub.f32 %v1982_v34, %v407_v39  ;;  %v3104_v46 = vand.u32 4294901760, %v1992_v40  ;;  %511 = vmatpush.msra.mxu2 %v1992_v40  ;;  %565 = vmatpush.msra.mxu3 %v1995_v41  ;;  %v2018_v55 = vsub.f32 %v338_v44, %v2007_v48 }
  0x1d   :  { %v81_v3 = vsub.f32 1.0, %v80_v2  ;;  %369 = vmatpush.msra.mxu0 %v1995_v41  ;;  %v3102_v54 = vand.u32 4294901760, %v2004_v47  ;;  %v2033_v0 = vsub.f32 %v334_v51, %v2022_v56  ;;  %v2037_v2 = vld [vmem:[#allocation7 + $0x120] sm:$0xff] }
  0x1e   :  { %v409_v52 = vand.u32 4294901760, %v408_v45  ;;  %v414_v53 = vsub.f32 %v1992_v40, %v3104_v46  ;;  %514 = vmatpush.msra.mxu2 %v2004_v47  ;;  %567 = vmatpush.msra.mxu3 %v2007_v48  ;;  %v3101_v61 = vand.u32 4294901760, %v2018_v55 }
  0x1f   :  { %v82_v4 = vmul.f32 %v1778_v1, %v81_v3  ;;  %371 = vmatpush.msra.mxu0 %v2007_v48  ;;  %v420_v60 = vsub.f32 %v2004_v47, %v3102_v54 }
  0x20   :  { %410 = vmatpush.msra.mxu1 %v409_v52  ;;  %v415_v59 = vand.u32 4294901760, %v414_v53  ;;  %517 = vmatpush.msra.mxu2 %v2018_v55 }
  0x21   :  { %v83_v6 = vadd.f32 %v1778_v1, %v82_v4  ;;  %569 = vmatpush.msra.mxu3 %v2022_v56  ;;  %373 = vmatpush.msra.mxu0 %v2022_v56 }
  0x22   :  { %416 = vmatpush.msra.mxu1 %v415_v59  ;;  %520 = vmatpush.msra.mxu2 %v2033_v0 }
  0x23   :  { %v85_v7 = vsel %vm84_vm0, %v1778_v1, %v83_v6  ;;  %v2035_v1 = vand.u32 4294901760, %v330_v57  ;;  %v426_v6 = vsub.f32 %v2018_v55, %v3101_v61 }
  0x24   :  { %v86_v8 = vmul.f32 %v85_v7, %v78_v5  ;;  %v421_v5 = vand.u32 4294901760, %v420_v60  ;;  %v322_v60 = vld [vmem:[#allocation7 + $0x100] sm:$0xff] }
  0x25   :  { %571 = vmatpush.msra.mxu3 %v2035_v1  ;;  %375 = vmatpush.msra.mxu0 %v2035_v1  ;;  %v2063_v38 = vsub.f32 %v330_v57, %v2035_v1 }
  0x26   :  { %v87_v9 = vfloor.f32 %v86_v8  ;;  %v1920_v8 = vmov 683565275   ;;  %422 = vmatpush.msra.mxu1 %v421_v5 }
  0x27   :  { %523 = vmatpush.msra.mxu2 %v2063_v38  ;;  %v3098_v59 = vand.u32 4294901760, %v2063_v38 }
  0x28   :  { %v88_v10 = vmul.f32 0.1, %v87_v9 }
  0x2a   :  { %90 = vrot.lane.b32.xlu0 %v88_v10, %s1914_s3  ;;  %96 = vrot.lane.b32.xlu1 %v88_v10, %s1915_s4 }
  0x2b   :  { %102 = vrot.lane.b32.xlu2 %v88_v10, %s1916_s13 }
  0x32   :  { %93 = vrot.lane.b32.xlu0 %v88_v10, %s1911_s0  ;;  %99 = vrot.lane.b32.xlu1 %v88_v10, %s1917_s14 }
  0x33   :  { %105 = vrot.lane.b32.xlu2 %v88_v10, %s1918_s15 }
  0x3a   :  { %108 = vrot.lane.b32.xlu0 %v88_v10, %s1919_s16 }
  0x85   :  { %v103_v13 = vpop.permute.xlu2 %102 }
  0x8d   :  { %v106_v20 = vpop.permute.xlu2 %105 }
  0x9c   :  { %v91_v11 = vpop.permute.xlu0 %90  ;;  %v97_v12 = vpop.permute.xlu1 %96 }
  0x9d   :  { %v112_v14 = vsel %vm111_vm1, %v88_v10, %v91_v11  ;;  %v1921_v10 = vmov 2475754826  }
  0xa4   :  { %v94_v15 = vpop.permute.xlu0 %93  ;;  %v100_v16 = vpop.permute.xlu1 %99 }
  0xa5   :  { %v114_v17 = vsel %vm113_vm2, %v112_v14, %v94_v15  ;;  %v1923_v15 = vmov 2102212464  }
  0xa6   :  { %v116_v18 = vsel %vm115_vm3, %v114_v17, %v97_v12  ;;  %v2052_v12 = vand.u32 4294901760, %v2037_v2  ;;  %v1924_v17 = vmov 920167782  }
  0xa7   :  { %v118_v19 = vsel %vm117_vm4, %v116_v18, %v100_v16 }
  0xa8   :  { %v120_v21 = vsel %vm119_vm5, %v118_v19, %v103_v13  ;;  %v1922_v13 = vmov 2131351028   ;;  %573 = vmatpush.msra.mxu3 %v2052_v12  ;;  %377 = vmatpush.msra.mxu0 %v2052_v12 }
  0xa9   :  { %v122_v23 = vsel %vm121_vm6, %v120_v21, %v106_v20 }
  0xac   :  { %v109_v25 = vpop.permute.xlu0 %108 }
  0xad   :  { %v124_v26 = vsel %vm123_vm7, %v122_v23, %v109_v25 }
  0xae   :  { %v129_v27 = vmul.f32 %v1775_v22, %v124_v26 }
  0xb0   :  { %v1975_v28 = vadd.f32 %v1776_v24, %v129_v27  ;;  %v1925_v24 = vmov 1326507024  }
  0xb2   :  { %v3088_v31 = vand.u32 2147483647, %v1975_v28  ;;  %v138_v32 = vand.u32 2139095040, %v1975_v28  ;;  %vm137_vm4 = vcmp.lt.s32.totalorder %v1975_v28, 0 }
  0xb4   :  { %v139_v36 = vshrl.u32 %v138_v32, 23  ;;  %v142_v37 = vand.u32 8388607, %v3088_v31  ;;  %v427_v32 = vand.u32 4294901760, %v426_v6 }
  0xb6   :  { %v1751_v42 = vadd.s32 4294967169, %v139_v36  ;;  %v143_v43 = vor.u32 8388608, %v142_v37  ;;  %v3099_v37 = vand.u32 4294901760, %v2033_v0  ;;  %428 = vmatpush.msra.mxu1 %v427_v32 }
  0xb8   :  { %v145_v49 = vadd.s32 1, %v1751_v42  ;;  %v2010_v50 = vshll.u32 %v143_v43, 8  ;;  %v432_v53 = vsub.f32 %v2033_v0, %v3099_v37 }
  0xba   :  { %vm146_vm8 = vcmp.gt.s32.totalorder %v145_v49, 0  ;;  %v2042_v3 = vand.u32 65535, %v2010_v50  ;;  %v2045_v4 = vshrl.u32 %v2010_v50, 16 }
  0xbb   :  { %v147_v58 = vsel %vm146_vm8, %v145_v49, 0 }
  0xbc   :  { %v2030_v62 = vshrl.u32 %v147_v58, 5  ;;  %v149_v63 = vand.u32 31, %v147_v58 }
  0xbe   :  { %v150_v7 = vsub.s32 32, %v149_v63  ;;  %v152_v9 = vshll.u32 %v1920_v8, %v149_v63  ;;  %v155_v11 = vshll.u32 %v1921_v10, %v149_v63  ;;  %v158_v14 = vshll.u32 %v1922_v13, %v149_v63 }
  0xbf   :  { %v161_v16 = vshll.u32 %v1923_v15, %v149_v63  ;;  %v164_v18 = vshll.u32 %v1924_v17, %v149_v63  ;;  %vm167_vm9 = vcmp.lt.s32.totalorder %v2030_v62, 1  ;;  %vm169_vm10 = vcmp.lt.s32.totalorder %v2030_v62, 3  ;;  %v2089_v63 = vld [vmem:[#allocation7 + $0xe0] sm:$0xff] }
  0xc0   :  { %v151_v19 = vshrl.u32 %v1920_v8, %v150_v7  ;;  %v153_v20 = vshrl.u32 %v1921_v10, %v150_v7  ;;  %v156_v21 = vshrl.u32 %v1922_v13, %v150_v7  ;;  %v159_v22 = vshrl.u32 %v1923_v15, %v150_v7 }
  0xc1   :  { %v162_v23 = vshrl.u32 %v1924_v17, %v150_v7  ;;  %v165_v25 = vshrl.u32 %v1925_v24, %v150_v7  ;;  %vm170_vm11 = vcmp.lt.s32.totalorder %v2030_v62, 4  ;;  %vm168_vm12 = vcmp.lt.s32.totalorder %v2030_v62, 2 }
  0xc2   :  { %v154_v26 = vor.u32 %v153_v20, %v152_v9  ;;  %v157_v27 = vor.u32 %v156_v21, %v155_v11  ;;  %v160_v29 = vor.u32 %v159_v22, %v158_v14  ;;  %v433_v8 = vand.u32 4294901760, %v432_v53 }
  0xc3   :  { %v163_v33 = vor.u32 %v162_v23, %v161_v16  ;;  %v166_v36 = vor.u32 %v165_v25, %v164_v18  ;;  %v438_v62 = vsub.f32 %v2063_v38, %v3098_v59  ;;  %v2098_v14 = vsub.f32 %v2037_v2, %v2052_v12 }
  0xc4   :  { %v171_v42 = vsel %vm167_vm9, %v151_v19, %v154_v26  ;;  %v172_v43 = vsel %vm170_vm11, %v160_v29, 2102212464  ;;  %v175_v44 = vsel %vm167_vm9, %v154_v26, %v157_v27  ;;  %v179_v45 = vsel %vm167_vm9, %v157_v27, %v160_v29  ;;  %434 = vmatpush.msra.mxu1 %v433_v8 }
  0xc5   :  { %v173_v49 = vsel %vm169_vm10, %v157_v27, %v172_v43  ;;  %v176_v51 = vsel %vm170_vm11, %v163_v33, 920167782  ;;  %v180_v52 = vsel %vm170_vm11, %v166_v36, 1326507024  ;;  %v2100_v15 = vand.u32 4294901760, %v322_v60  ;;  %526 = vmatpush.msra.mxu2 %v2098_v14 }
  0xc6   :  { %v177_v57 = vsel %vm169_vm10, %v160_v29, %v176_v51  ;;  %v181_v58 = vsel %vm169_vm10, %v163_v33, %v180_v52  ;;  %v2091_v5 = vsel %vm168_vm12, %v171_v42, %v173_v49  ;;  %v2103_v16 = vand.u32 4294901760, %v2089_v63 }
  0xc7   :  { %v178_v6 = vsel %vm168_vm12, %v175_v44, %v177_v57  ;;  %v182_v7 = vsel %vm168_vm12, %v179_v45, %v181_v58  ;;  %575 = vmatpush.msra.mxu3 %v2100_v15  ;;  %379 = vmatpush.msra.mxu0 %v2100_v15  ;;  %v439_v42 = vand.u32 4294901760, %v438_v62  ;;  %v1926_v43 = vmov 0   ;;  %v314_v57 = vld [vmem:[#allocation7 + $0xc0] sm:$0xff] }
  0xc8   :  { %v186_v9 = vand.u32 65535, %v182_v7  ;;  %v187_v10 = vshrl.u32 %v182_v7, 16  ;;  %v208_v11 = vand.u32 65535, %v178_v6  ;;  %v209_v13 = vshrl.u32 %v178_v6, 16  ;;  %v310_v58 = vld [vmem:[#allocation7 + $0xa0] sm:$0xff] }
  0xc9   :  { %577 = vmatpush.msra.mxu3 %v2103_v16  ;;  %381 = vmatpush.msra.mxu0 %v2103_v16  ;;  %v2124_v49 = vsub.f32 %v322_v60, %v2100_v15  ;;  %v302_v60 = vld [vmem:[#allocation7 + $0x60] sm:$0xff]  ;;  %vm278_vm9 = vweird.f32 %v1975_v28 }
  0xca   :  { %v188_v17 = vmul.u32 %v186_v9, %v2042_v3  ;;  %v189_v18 = vmul.u32 %v187_v10, %v2042_v3  ;;  %v190_v19 = vmul.u32 %v186_v9, %v2045_v4  ;;  %v191_v20 = vmul.u32 %v187_v10, %v2045_v4  ;;  %440 = vmatpush.msra.mxu1 %v439_v42  ;;  %v306_v9 = vld [vmem:[#allocation7 + $0x80] sm:$0xff] }
  0xcb   :  { %v210_v21 = vmul.u32 %v208_v11, %v2042_v3  ;;  %v211_v22 = vmul.u32 %v209_v13, %v2042_v3  ;;  %v2112_v2 = vmul.u32 %v208_v11, %v2045_v4  ;;  %v213_v23 = vmul.u32 %v209_v13, %v2045_v4  ;;  %529 = vmatpush.msra.mxu2 %v2124_v49 }
  0xcc   :  { %v192_v24 = vshll.u32 %v189_v18, 16  ;;  %v193_v25 = vshrl.u32 %v189_v18, 16  ;;  %v194_v26 = vshll.u32 %v190_v19, 16  ;;  %v195_v27 = vshrl.u32 %v190_v19, 16 }
  0xcd   :  { %v214_v29 = vshll.u32 %v211_v22, 16  ;;  %v215_v32 = vshrl.u32 %v211_v22, 16  ;;  %v216_v33 = vshll.u32 %v2112_v2, 16  ;;  %v217_v3 = vshrl.u32 %v2112_v2, 16 }
  0xce   :  { %vm196_vm13 = vc.u32 %v188_v17, %v192_v24  ;;  %v198_v36 = vadd.s32 %v192_v24, %v188_v17  ;;  %v3095_v4 = vand.u32 4294901760, %v2098_v14  ;;  %v3094_v62 = vand.u32 4294901760, %v2124_v49 }
  0xcf   :  { %v197_v44 = vsel %vm196_vm13, 1, %v1926_v43  ;;  %vm218_vm14 = vc.u32 %v210_v21, %v214_v29  ;;  %v220_v45 = vadd.s32 %v214_v29, %v210_v21  ;;  %v2135_v18 = vsub.f32 %v2089_v63, %v2103_v16 }
  0xd0   :  { %v199_v51 = vadd.s32 %v197_v44, %v191_v20  ;;  %vm200_vm15 = vc.u32 %v198_v36, %v194_v26  ;;  %v219_v52 = vsel %vm218_vm14, 1, %v1926_v43  ;;  %v444_v53 = vsub.f32 %v2098_v14, %v3095_v4 }
  0xd1   :  { %v201_v6 = vsel %vm200_vm15, 1, %v1926_v43  ;;  %v221_v7 = vadd.s32 %v219_v52, %v213_v23  ;;  %vm222_vm0 = vc.u32 %v220_v45, %v216_v33  ;;  %v2129_v8 = vadd.s32 %v220_v45, %v216_v33  ;;  %532 = vmatpush.msra.mxu2 %v2135_v18 }
  0xd2   :  { %v203_v10 = vadd.s32 %v201_v6, %v199_v51  ;;  %v223_v11 = vsel %vm222_vm0, 1, %v1926_v43  ;;  %v445_v13 = vand.u32 4294901760, %v444_v53  ;;  %v2137_v19 = vand.u32 4294901760, %v314_v57  ;;  %v294_v51 = vld [vmem:[#allocation7 + $0x20] sm:$0xff] }
  0xd3   :  { %v225_v17 = vadd.s32 %v223_v11, %v221_v7  ;;  %v2139_v20 = vand.u32 4294901760, %v310_v58  ;;  %v450_v22 = vsub.f32 %v2124_v49, %v3094_v62  ;;  %v2144_v2 = vand.u32 4294901760, %v306_v9  ;;  %v351_v11 = vld [vmem:[#allocation7 + $0x1e8] sm:$0xff] }
  0xd4   :  { %v204_v21 = vadd.s32 %v203_v10, %v193_v25  ;;  %446 = vmatpush.msra.mxu1 %v445_v13  ;;  %v2146_v23 = vand.u32 4294901760, %v302_v60  ;;  %v3093_v26 = vand.u32 4294901760, %v2135_v18  ;;  %v2150_v63 = vsub.f32 %v314_v57, %v2137_v19  ;;  %579 = vmatpush.msra.mxu3 %v2137_v19  ;;  %v290_v57 = vld [vmem:[#allocation7] sm:$0xff]  ;;  %v347_v13 = vld [vmem:[#allocation7 + $0x1c8] sm:$0xff] }
  0xd5   :  { %v226_v24 = vadd.s32 %v225_v17, %v215_v32  ;;  %v2154_v29 = vsub.f32 %v310_v58, %v2139_v20  ;;  %v451_v33 = vand.u32 4294901760, %v450_v22  ;;  %v2160_v36 = vsub.f32 %v306_v9, %v2144_v2  ;;  %383 = vmatpush.msra.mxu0 %v2137_v19  ;;  %v331_v62 = vld [vmem:[#allocation7 + $0x148] sm:$0xff] }
  0xd6   :  { %v2157_v25 = vadd.s32 %v204_v21, %v195_v27  ;;  %v2163_v32 = vsub.f32 %v302_v60, %v2146_v23  ;;  %v456_v43 = vsub.f32 %v2135_v18, %v3093_v26  ;;  %v3091_v44 = vand.u32 4294901760, %v2150_v63  ;;  %535 = vmatpush.msra.mxu2 %v2150_v63  ;;  %581 = vmatpush.msra.mxu3 %v2139_v20  ;;  %v298_v27 = vld [vmem:[#allocation7 + $0x40] sm:$0xff] }
  0xd7   :  { %v227_v42 = vadd.s32 %v226_v24, %v217_v3  ;;  %v3090_v45 = vand.u32 4294901760, %v2154_v29  ;;  %v228_v52 = vmul.u32 %v2010_v50, %v2091_v5  ;;  %452 = vmatpush.msra.mxu1 %v451_v33  ;;  %v3089_v3 = vand.u32 4294901760, %v2160_v36  ;;  %385 = vmatpush.msra.mxu0 %v2139_v20  ;;  %v343_v33 = vld [vmem:[#allocation7 + $0x1a8] sm:$0xff] }
  0xd8   :  { %vm230_vm1 = vc.u32 %v2157_v25, %v2129_v8  ;;  %v3087_v53 = vand.u32 4294901760, %v2163_v32  ;;  %v457_v6 = vand.u32 4294901760, %v456_v43  ;;  %v462_v7 = vsub.f32 %v2150_v63, %v3091_v44  ;;  %538 = vmatpush.msra.mxu2 %v2154_v29  ;;  %583 = vmatpush.msra.mxu3 %v2144_v2 }
  0xd9   :  { %v231_v58 = vadd.s32 1, %v227_v42  ;;  %v468_v50 = vsub.f32 %v2154_v29, %v3090_v45  ;;  %v474_v5 = vsub.f32 %v2160_v36, %v3089_v3  ;;  %v2194_v60 = vand.u32 4294901760, %v298_v27  ;;  %387 = vmatpush.msra.mxu0 %v2144_v2 }
  0xda   :  { %v480_v9 = vsub.f32 %v2163_v32, %v3087_v53  ;;  %v2196_v10 = vand.u32 4294901760, %v294_v51  ;;  %458 = vmatpush.msra.mxu1 %v457_v6  ;;  %v463_v21 = vand.u32 4294901760, %v462_v7  ;;  %541 = vmatpush.msra.mxu2 %v2160_v36  ;;  %v2203_v24 = vand.u32 4294901760, %v290_v57  ;;  %v339_v7 = vld [vmem:[#allocation7 + $0x188] sm:$0xff] }
  0xdb   :  { %v232_v17 = vsel %vm230_vm1, %v231_v58, %v227_v42  ;;  %v469_v22 = vand.u32 4294901760, %v468_v50  ;;  %v475_v53 = vand.u32 4294901760, %v474_v5  ;;  %v2206_v31 = vsub.f32 %v298_v27, %v2194_v60  ;;  %585 = vmatpush.msra.mxu3 %v2146_v23  ;;  %389 = vmatpush.msra.mxu0 %v2146_v23 }
  0xdc   :  { %v233_v43 = vadd.s32 %v232_v17, %v228_v52  ;;  %464 = vmatpush.msra.mxu1 %v463_v21  ;;  %544 = vmatpush.msra.mxu2 %v2163_v32  ;;  %v2212_v42 = vsub.f32 %v294_v51, %v2196_v10  ;;  %v2215_v58 = vsub.f32 %v290_v57, %v2203_v24  ;;  %v2217_v6 = vand.u32 4294901760, %v351_v11 }
  0xdd   :  { %v2219_v52 = vand.u32 4294901760, %v347_v13  ;;  %v481_v50 = vand.u32 4294901760, %v480_v9  ;;  %v3092_v5 = vand.u32 4294901760, %v2206_v31  ;;  %587 = vmatpush.msra.mxu3 %v2194_v60  ;;  %391 = vmatpush.msra.mxu0 %v2194_v60  ;;  %v2224_v17 = vand.u32 4294901760, %v343_v33 }
  0xde   :  { %v234_v27 = vadd.s32 536870912, %v233_v43  ;;  %470 = vmatpush.msra.mxu1 %v469_v22  ;;  %v3096_v51 = vand.u32 4294901760, %v2212_v42  ;;  %547 = vmatpush.msra.mxu2 %v2206_v31  ;;  %v3097_v57 = vand.u32 4294901760, %v2215_v58  ;;  %v2230_v21 = vsub.f32 %v351_v11, %v2217_v6  ;;  %v335_v11 = vld [vmem:[#allocation7 + $0x168] sm:$0xff] }
  0xdf   :  { %v2233_v9 = vsub.f32 %v347_v13, %v2219_v52  ;;  %v486_v45 = vsub.f32 %v2206_v31, %v3092_v5  ;;  %589 = vmatpush.msra.mxu3 %v2196_v10  ;;  %393 = vmatpush.msra.mxu0 %v2196_v10  ;;  %v2242_v22 = vand.u32 4294901760, %v339_v7  ;;  %v2245_v44 = vsub.f32 %v343_v33, %v2224_v17 }
  0xe0   :  { %v2235_v3 = vshrl.u32 %v234_v27, 30  ;;  %476 = vmatpush.msra.mxu1 %v475_v53  ;;  %v492_v13 = vsub.f32 %v2212_v42, %v3096_v51  ;;  %v498_v27 = vsub.f32 %v2215_v58, %v3097_v57  ;;  %550 = vmatpush.msra.mxu2 %v2212_v42  ;;  %v3100_v5 = vand.u32 4294901760, %v2230_v21 }
  0xe1   :  { %3146 = vst [vmem:[#allocation15_spill] sm:$0xff] %v2245_v44  ;;  %v3103_v26 = vand.u32 4294901760, %v2233_v9  ;;  %v487_v4 = vand.u32 4294901760, %v486_v45  ;;  %591 = vmatpush.msra.mxu3 %v2203_v24  ;;  %395 = vmatpush.msra.mxu0 %v2203_v24  ;;  %v3105_v53 = vand.u32 4294901760, %v2245_v44  ;;  %v2267_v37 = vand.u32 4294901760, %v335_v11 }
  0xe2   :  { %v236_v33 = vshll.u32 %v2235_v3, 30  ;;  %482 = vmatpush.msra.mxu1 %v481_v50  ;;  %v493_v51 = vand.u32 4294901760, %v492_v13  ;;  %553 = vmatpush.msra.mxu2 %v2215_v58  ;;  %v749_v57 = vsub.f32 %v2230_v21, %v3100_v5  ;;  %v2277_v13 = vand.u32 4294901760, %v331_v62  ;;  %v327_v5 = vld [vmem:[#allocation7 + $0x128] sm:$0xff] }
  0xe3   :  { %v755_v59 = vsub.f32 %v2233_v9, %v3103_v26  ;;  %602 = vmatpush.msrb.mxu0 %v407_v39  ;;  %v761_v50 = vsub.f32 %v2245_v44, %v3105_v53  ;;  %v499_v61 = vand.u32 4294901760, %v498_v27  ;;  %v2280_v46 = vsub.f32 %v339_v7, %v2242_v22  ;;  %v323_v27 = vld [vmem:[#allocation7 + $0x108] sm:$0xff] }
  0xe4   :  { %v2269_v45 = vsub.s32 %v233_v43, %v236_v33  ;;  %706 = vmatpush.msrb.mxu2 %v2217_v6  ;;  %488 = vmatpush.msra.mxu1 %v487_v4  ;;  %v750_v54 = vand.u32 4294901760, %v749_v57  ;;  %v3147_v39 = vand.u32 4294901760, %v1992_v40  ;;  %v2289_v57 = vsub.f32 %v335_v11, %v2267_v37  ;;  %v319_v33 = vld [vmem:[#allocation7 + $0xe8] sm:$0xff] }
  0xe5   :  { %v756_v26 = vand.u32 4294901760, %v755_v59  ;;  %v762_v34 = vand.u32 4294901760, %v761_v50  ;;  %v3110_v4 = vand.u32 4294901760, %v2280_v46  ;;  %v2291_v59 = vand.u32 4294901760, %v327_v5  ;;  %v315_v53 = vld [vmem:[#allocation7 + $0xc8] sm:$0xff] }
  0xe6   :  { %vm238_vm2 = vcmp.lt.s32.totalorder %v2269_v45, 0  ;;  %v239_v43 = vsub.s32 0, %v2269_v45  ;;  %708 = vmatpush.msrb.mxu2 %v2219_v52  ;;  %606 = vmatpush.msrb.mxu0 %v3147_v39  ;;  %v2294_v7 = vsub.f32 %v331_v62, %v2277_v13  ;;  %v229_v50 = vadd.s32 %v2129_v8, %v2157_v25  ;;  %v311_v44 = vld [vmem:[#allocation7 + $0xa8] sm:$0xff] }
  0xe7   :  { %494 = vmatpush.msra.mxu1 %v493_v51  ;;  %751 = vmatpush.msrb.mxu3 %v750_v54  ;;  %v3148_v54 = vand.u32 4294901760, %v2004_v47  ;;  %v767_v62 = vsub.f32 %v2280_v46, %v3110_v4  ;;  %v3109_v11 = vand.u32 4294901760, %v2289_v57  ;;  %v2309_v8 = vand.u32 4294901760, %v323_v27 }
  0xe8   :  { %v240_v40 = vsel %vm238_vm2, %v239_v43, %v2269_v45  ;;  %710 = vmatpush.msrb.mxu2 %v2224_v17  ;;  %v3108_v39 = vand.u32 4294901760, %v2294_v7  ;;  %v2312_v47 = vsub.f32 %v327_v5, %v2291_v59 }
  0xe9   :  { %610 = vmatpush.msrb.mxu0 %v3148_v54  ;;  %v241_v51 = vclz %v240_v40  ;;  %500 = vmatpush.msra.mxu1 %v499_v61  ;;  %v2314_v61 = vand.u32 4294901760, %v319_v33  ;;  %v768_v43 = vand.u32 4294901760, %v767_v62  ;;  %v773_v40 = vsub.f32 %v2289_v57, %v3109_v11  ;;  %v307_v11 = vld [vmem:[#allocation7 + $0x88] sm:$0xff] }
  0xea   :  { %757 = vmatpush.msrb.mxu3 %v756_v26  ;;  %712 = vmatpush.msrb.mxu2 %v2242_v22  ;;  %v2316_v26 = vand.u32 4294901760, %v315_v53  ;;  %v779_v54 = vsub.f32 %v2294_v7, %v3108_v39  ;;  %v3111_v5 = vand.u32 4294901760, %v2312_v47  ;;  %v2335_v62 = vand.u32 4294901760, %v311_v44 }
  0xeb   :  { %669 = vmatpush.msrb.mxu1 %v1977_v30  ;;  %v1752_v25 = vadd.s32 4294967294, %v241_v51  ;;  %v3149_v30 = vand.u32 4294901760, %v2018_v55  ;;  %v2333_v51 = vsub.f32 %v319_v33, %v2314_v61  ;;  %v774_v55 = vand.u32 4294901760, %v773_v40 }
  0xec   :  { %763 = vmatpush.msrb.mxu3 %v762_v34  ;;  %714 = vmatpush.msrb.mxu2 %v2267_v37  ;;  %v2330_v34 = vsub.f32 %v323_v27, %v2309_v8  ;;  %v3151_v39 = vand.u32 4294901760, %v2033_v0  ;;  %v785_v27 = vsub.f32 %v2312_v47, %v3111_v5 }
  0xed   :  { %614 = vmatpush.msrb.mxu0 %v3149_v30  ;;  %671 = vmatpush.msrb.mxu1 %v1984_v35  ;;  %vm1753_vm3 = vcmp.lt.s32.totalorder %v1752_v25, 0  ;;  %v780_v30 = vand.u32 4294901760, %v779_v54  ;;  %v2340_v35 = vsub.f32 %v315_v53, %v2316_v26  ;;  %v3152_v53 = vand.u32 4294901760, %v2063_v38 }
  0xee   :  { %3150 = vst [vmem:[#allocation16_spill] sm:$0xff] %v2330_v34  ;;  %769 = vmatpush.msrb.mxu3 %v768_v43  ;;  %v244_v4 = vsel %vm1753_vm3, 0, %v1752_v25  ;;  %716 = vmatpush.msrb.mxu2 %v2277_v13  ;;  %v3112_v33 = vand.u32 4294901760, %v2330_v34  ;;  %v3115_v43 = vand.u32 4294901760, %v2333_v51  ;;  %v303_v25 = vld [vmem:[#allocation7 + $0x68] sm:$0xff]  ;;  %v786_v54 = vand.u32 4294901760, %v785_v27 }
  0xef   :  { %618 = vmatpush.msrb.mxu0 %v3151_v39  ;;  %673 = vmatpush.msrb.mxu1 %v1995_v41  ;;  %v245_v40 = vsub.s32 32, %v244_v4  ;;  %v246_v0 = vshll.u32 %v2269_v45, %v244_v4  ;;  %v249_v39 = vsub.s32 4294967266, %v244_v4  ;;  %v3116_v41 = vand.u32 4294901760, %v2340_v35 }
  0xf0   :  { %775 = vmatpush.msrb.mxu3 %v774_v55  ;;  %718 = vmatpush.msrb.mxu2 %v2291_v59  ;;  %v791_v5 = vsub.f32 %v2330_v34, %v3112_v33  ;;  %v797_v45 = vsub.f32 %v2333_v51, %v3115_v43  ;;  %v2361_v4 = vand.u32 4294901760, %v307_v11  ;;  %v2369_v27 = vsub.f32 %v311_v44, %v2335_v62  ;;  %v299_v33 = vld [vmem:[#allocation7 + $0x48] sm:$0xff] }
  0xf1   :  { %622 = vmatpush.msrb.mxu0 %v3152_v53  ;;  %675 = vmatpush.msrb.mxu1 %v2007_v48  ;;  %v247_v38 = vshrl.u32 %v229_v50, %v245_v40  ;;  %v250_v55 = vadd.s32 127, %v249_v39  ;;  %v3153_v53 = vand.u32 4294901760, %v2098_v14  ;;  %v803_v48 = vsub.f32 %v2340_v35, %v3116_v41  ;;  %v295_v34 = vld [vmem:[#allocation7 + $0x28] sm:$0xff] }
  0xf2   :  { %781 = vmatpush.msrb.mxu3 %v780_v30  ;;  %720 = vmatpush.msrb.mxu2 %v2309_v8  ;;  %v792_v43 = vand.u32 4294901760, %v791_v5  ;;  %v2373_v50 = vand.u32 4294901760, %v303_v25  ;;  %v2376_v30 = vsub.f32 %v307_v11, %v2361_v4  ;;  %v291_v14 = vld [vmem:[#allocation7 + $0x8] sm:$0xff]  ;;  %v3154_v44 = vand.u32 4294901760, %v2124_v49 }
  0xf3   :  { %626 = vmatpush.msrb.mxu0 %v3153_v53  ;;  %677 = vmatpush.msrb.mxu1 %v2022_v56  ;;  %v248_v40 = vor.u32 %v247_v38, %v246_v0  ;;  %v251_v39 = vshll.u32 %v250_v55, 23  ;;  %v798_v53 = vand.u32 4294901760, %v797_v45  ;;  %v808_v41 = vand.u32 4294901760, %v2369_v27 }
  0xf4   :  { %787 = vmatpush.msrb.mxu3 %v786_v54  ;;  %722 = vmatpush.msrb.mxu2 %v2314_v61  ;;  %v814_v56 = vand.u32 4294901760, %v2376_v30  ;;  %v2384_v5 = vand.u32 4294901760, %v299_v33  ;;  %v2387_v11 = vsub.f32 %v303_v25, %v2373_v50  ;;  %v2389_v0 = vand.u32 4294901760, %v295_v34 }
  0xf5   :  { %630 = vmatpush.msrb.mxu0 %v3154_v44  ;;  %679 = vmatpush.msrb.mxu1 %v2035_v1  ;;  %v252_v54 = vor.u32 4788187, %v251_v39  ;;  %v804_v45 = vand.u32 4294901760, %v803_v48  ;;  %v3155_v49 = vand.u32 4294901760, %v2135_v18  ;;  %v809_v1 = vsub.f32 %v2369_v27, %v808_v41 }
  0xf6   :  { %793 = vmatpush.msrb.mxu3 %v792_v43  ;;  %v2396_v38 = vand.u32 4294901760, %v291_v14  ;;  %724 = vmatpush.msrb.mxu2 %v2316_v26  ;;  %v815_v25 = vsub.f32 %v2376_v30, %v814_v56  ;;  %v820_v43 = vand.u32 4294901760, %v2387_v11  ;;  %v2405_v55 = vsub.f32 %v299_v33, %v2384_v5 }
  0xf7   :  { %634 = vmatpush.msrb.mxu0 %v3155_v49  ;;  %681 = vmatpush.msrb.mxu1 %v2052_v12  ;;  %v2408_v18 = vsub.f32 %v295_v34, %v2389_v0  ;;  %v253_v48 = vand.u32 2147483647, %v252_v54  ;;  %v255_v39 = vcvt.s32.f32 %v248_v40  ;;  %v810_v44 = vand.u32 4294901760, %v809_v1 }
  0xf8   :  { %799 = vmatpush.msrb.mxu3 %v798_v53  ;;  %v3156_v12 = vand.u32 4294901760, %v2150_v63  ;;  %v2413_v49 = vsub.f32 %v291_v14, %v2396_v38  ;;  %726 = vmatpush.msrb.mxu2 %v2335_v62  ;;  %v821_v33 = vsub.f32 %v2387_v11, %v820_v43  ;;  %v826_v34 = vand.u32 4294901760, %v2405_v55 }
  0xf9   :  { %683 = vmatpush.msrb.mxu1 %v2100_v15  ;;  %v832_v40 = vand.u32 4294901760, %v2408_v18  ;;  %v256_v53 = vmul.f32 %v255_v39, %v253_v48  ;;  %v816_v54 = vand.u32 4294901760, %v815_v25  ;;  %v3157_v63 = vand.u32 4294901760, %v2154_v29 }
  0xfa   :  { %638 = vmatpush.msrb.mxu0 %v3156_v12  ;;  %805 = vmatpush.msrb.mxu3 %v804_v45  ;;  %v838_v14 = vand.u32 4294901760, %v2413_v49  ;;  %v827_v15 = vsub.f32 %v2405_v55, %v826_v34  ;;  %v822_v12 = vand.u32 4294901760, %v821_v33  ;;  %v3158_v48 = vand.u32 4294901760, %v2160_v36 }
  0xfb   :  { %685 = vmatpush.msrb.mxu1 %v2103_v16  ;;  %728 = vmatpush.msrb.mxu2 %v2361_v4  ;;  %v257_v1 = vxor.u32 2147483648, %v256_v53  ;;  %v833_v29 = vsub.f32 %v2408_v18, %v832_v40  ;;  %v3159_v16 = vand.u32 2147483647, %v1975_v28  ;;  %v3162_v39 = vand.u32 4294901760, %v2163_v32 }
  0xfc   :  { %642 = vmatpush.msrb.mxu0 %v3157_v63  ;;  %811 = vmatpush.msrb.mxu3 %v810_v44  ;;  %v828_v25 = vand.u32 4294901760, %v827_v15 }
  0xfd   :  { %687 = vmatpush.msrb.mxu1 %v2137_v19  ;;  %730 = vmatpush.msrb.mxu2 %v2373_v50  ;;  %vm2440_vm5 = vcmp.le.f32.partialorder %v3159_v16, 0.7853982  ;;  %v258_v36 = vsel %vm137_vm4, %v257_v1, %v256_v53  ;;  %v839_v19 = vsub.f32 %v2413_v49, %v838_v14  ;;  %v834_v53 = vand.u32 4294901760, %v833_v29 }
  0xfe   :  { %646 = vmatpush.msrb.mxu0 %v3158_v48  ;;  %817 = vmatpush.msrb.mxu3 %v816_v54  ;;  %v261_v44 = vsel %vm2440_vm5, %v1975_v28, %v258_v36  ;;  %v3163_v54 = vand.u32 4294901760, %v2206_v31  ;;  %v3164_v1 = vand.u32 4294901760, %v2212_v42  ;;  %v3168_v28 = vand.u32 4294901760, %v2230_v21 }
  0xff   :  { %689 = vmatpush.msrb.mxu1 %v2139_v20  ;;  %732 = vmatpush.msrb.mxu2 %v2384_v5  ;;  %v263_v33 = vmul.f32 %v261_v44, %v261_v44  ;;  %v840_v15 = vand.u32 4294901760, %v839_v19  ;;  %v259_v20 = vsub.s32 4, %v2235_v3 }
 0x100   :  { %650 = vmatpush.msrb.mxu0 %v3162_v39  ;;  %823 = vmatpush.msrb.mxu3 %v822_v12 }
 0x101   :  { %691 = vmatpush.msrb.mxu1 %v2144_v2  ;;  %734 = vmatpush.msrb.mxu2 %v2389_v0  ;;  %v264_v32 = vmul.f32 -0.001358992, %v263_v33  ;;  %v271_v63 = vmul.f32 -0.00019511016, %v263_v33  ;;  %v3165_v2 = vand.u32 4294901760, %v2215_v58  ;;  %v260_v42 = vsel %vm137_vm4, %v259_v20, %v2235_v3 }
 0x102   :  { %654 = vmatpush.msrb.mxu0 %v3163_v54  ;;  %829 = vmatpush.msrb.mxu3 %v828_v25  ;;  %v262_v36 = vsel %vm2440_vm5, 0, %v260_v42  ;;  %v3169_v20 = vand.u32 4294901760, %v2233_v9 }
 0x103   :  { %693 = vmatpush.msrb.mxu1 %v2146_v23  ;;  %736 = vmatpush.msrb.mxu2 %v2396_v38  ;;  %v265_v12 = vadd.f32 0.041655596, %v264_v32  ;;  %v272_v31 = vadd.f32 0.008332121, %v271_v63  ;;  %v279_v19 = vand.u32 3, %v262_v36 }
 0x104   :  { %658 = vmatpush.msrb.mxu0 %v3164_v1  ;;  %835 = vmatpush.msrb.mxu3 %v834_v53 }
 0x105   :  { %695 = vmatpush.msrb.mxu1 %v2194_v60  ;;  %v266_v48 = vmul.f32 %v265_v12, %v263_v33  ;;  %v273_v29 = vmul.f32 %v272_v31, %v263_v33  ;;  %vm281_vm6 = vcmp.eq.s32.totalorder %v279_v19, 0  ;;  %vm284_vm7 = vcmp.eq.s32.totalorder %v279_v19, 2  ;;  %v3170_v31 = vld [vmem:[#allocation15_spill] sm:$0xff] }
 0x106   :  { %662 = vmatpush.msrb.mxu0 %v3165_v2  ;;  %841 = vmatpush.msrb.mxu3 %v840_v15  ;;  %vm280_vm8 = vcmp.lt.s32.totalorder %v279_v19, 2  ;;  %v3171_v2 = vand.u32 4294901760, %v3170_v31 }
 0x107   :  { %697 = vmatpush.msrb.mxu1 %v2196_v10  ;;  %v267_v23 = vadd.f32 -0.4999988, %v266_v48  ;;  %v274_v16 = vadd.f32 -0.16666654, %v273_v29  ;;  %v3172_v48 = vand.u32 4294901760, %v2280_v46  ;;  %v344_v29 = vld [vmem:[#allocation7 + $0x1b0] sm:$0xff] }
 0x108   :  { %v2540_v36 = vand.u32 4294901760, %v344_v29 }
 0x109   :  { %699 = vmatpush.msrb.mxu1 %v2203_v24  ;;  %v268_v58 = vmul.f32 %v267_v23, %v263_v33  ;;  %v275_v25 = vmul.f32 %v274_v16, %v263_v33 }
 0x10b   :  { %v269_v39 = vadd.f32 1.0, %v268_v58  ;;  %v276_v60 = vadd.f32 1.0, %v275_v25 }
 0x10d   :  { %v277_v53 = vmul.f32 %v276_v60, %v261_v44  ;;  %v285_v54 = vxor.u32 2147483648, %v269_v39  ;;  %v332_v60 = vld [vmem:[#allocation7 + $0x150] sm:$0xff] }
 0x10f   :  { %v282_v32 = vxor.u32 2147483648, %v277_v53  ;;  %v286_v10 = vsel %vm284_vm7, %v285_v54, %v277_v53  ;;  %v2574_v53 = vand.u32 4294901760, %v332_v60  ;;  %v324_v54 = vld [vmem:[#allocation7 + $0x110] sm:$0xff] }
 0x111   :  { %v283_v3 = vsel %vm281_vm6, %v269_v39, %v282_v32  ;;  %v2559_v39 = vsub.f32 %v344_v29, %v2540_v36 }
 0x112   :  { %v287_v63 = vsel %vm280_vm8, %v283_v3, %v286_v10  ;;  %v2597_v3 = vand.u32 4294901760, %v324_v54  ;;  %v320_v10 = vld [vmem:[#allocation7 + $0xf0] sm:$0xff] }
 0x113   :  { %v288_v24 = vsel %vm278_vm9, nan, %v287_v63 }
 0x114   :  { %v289_v15 = vmax.f32 %v288_v24, 0.0 }
 0x116   :  { %v2476_v45 = vand.u32 4294901760, %v289_v15 }
 0x118   :  { %502 = vmatmul.f32.vlgmr.msra.gmra.mxu1 %v2476_v45  ;;  %v2480_v33 = vsub.f32 %v289_v15, %v2476_v45  ;;  %v2616_v15 = vand.u32 4294901760, %v320_v10 }
 0x119   :  { %902 = vmatpush.msra.mxu1 %v2217_v6 }
 0x11a   :  { %3166 = vst [vmem:[#allocation17_spill] sm:$0xff] %v2480_v33  ;;  %556 = vmatmul.f32.vlgmr.msra.gmra.mxu2 %v2480_v33  ;;  %v2485_v44 = vand.u32 4294901760, %v2480_v33 }
 0x11b   :  { %904 = vmatpush.msra.mxu1 %v2219_v52  ;;  %943 = vmatpush.msra.mxu2 %v3168_v28  ;;  %v2625_v28 = vsub.f32 %v324_v54, %v2597_v3  ;;  %v292_v54 = vld [vmem:[#allocation7 + $0x10] sm:$0xff] }
 0x11c   :  { %3167 = vst [vmem:[#allocation18_spill] sm:$0xff] %v2485_v44  ;;  %595 = vmatmul.f32.vlgmr.msra.gmra.mxu3 %v2485_v44  ;;  %v399_v1 = vsub.f32 %v2480_v33, %v2485_v44 }
 0x11d   :  { %906 = vmatpush.msra.mxu1 %v2224_v17  ;;  %947 = vmatpush.msra.mxu2 %v3169_v20 }
 0x11e   :  { %1010 = vmatpush.msra.mxu3 %v2217_v6  ;;  %v2497_v12 = vand.u32 4294901760, %v399_v1  ;;  %v3173_v6 = vand.u32 4294901760, %v2289_v57  ;;  %v312_v1 = vld [vmem:[#allocation7 + $0xb0] sm:$0xff] }
 0x11f   :  { %908 = vmatpush.msra.mxu1 %v2242_v22  ;;  %951 = vmatpush.msra.mxu2 %v3171_v2  ;;  %v308_v2 = vld [vmem:[#allocation7 + $0x90] sm:$0xff] }
 0x120   :  { %1012 = vmatpush.msra.mxu3 %v2219_v52  ;;  %401 = vmatmul.f32.vlgmr.msra.gmra.mxu0 %v2497_v12  ;;  %v352_v52 = vld [vmem:[#allocation7 + $0x1f0] sm:$0xff] }
 0x121   :  { %701 = vmatmul.f32.vlgmr.msrb.gmra.mxu1 %v2476_v45  ;;  %849 = vmatpush.msra.mxu0 %v2230_v21  ;;  %v348_v21 = vld [vmem:[#allocation7 + $0x1d0] sm:$0xff] }
 0x122   :  { %910 = vmatpush.msra.mxu1 %v2267_v37  ;;  %955 = vmatpush.msra.mxu2 %v3172_v48  ;;  %v2530_v42 = vand.u32 4294901760, %v348_v21  ;;  %v2643_v48 = vand.u32 4294901760, %v312_v1 }
 0x123   :  { %1014 = vmatpush.msra.mxu3 %v2224_v17  ;;  %742 = vmatmul.f32.vlgmr.msrb.gmra.mxu2 %v2497_v12  ;;  %v3174_v17 = vand.u32 4294901760, %v2294_v7 }
 0x124   :  { %852 = vmatpush.msra.mxu0 %v2233_v9  ;;  %912 = vmatpush.msra.mxu1 %v2277_v13  ;;  %v2523_v9 = vand.u32 4294901760, %v352_v52  ;;  %v2548_v58 = vsub.f32 %v348_v21, %v2530_v42  ;;  %v2655_v21 = vand.u32 4294901760, %v308_v2 }
 0x125   :  { %959 = vmatpush.msra.mxu2 %v3173_v6  ;;  %1016 = vmatpush.msra.mxu3 %v2242_v22  ;;  %v3175_v22 = vand.u32 4294901760, %v2312_v47  ;;  %v3125_v6 = vand.u32 4294901760, %v2625_v28 }
 0x126   :  { %843 = vmatmul.f32.vlgmr.msrb.gmra.mxu3 %v2476_v45  ;;  %855 = vmatpush.msra.mxu0 %v3170_v31  ;;  %v2538_v16 = vsub.f32 %v352_v52, %v2523_v9  ;;  %v304_v52 = vld [vmem:[#allocation7 + $0x70] sm:$0xff] }
 0x127   :  { %914 = vmatpush.msra.mxu1 %v2291_v59  ;;  %963 = vmatpush.msra.mxu2 %v3174_v17 }
 0x128   :  { %1018 = vmatpush.msra.mxu3 %v2267_v37  ;;  %858 = vmatpush.msra.mxu0 %v2280_v46  ;;  %v340_v37 = vld [vmem:[#allocation7 + $0x190] sm:$0xff] }
 0x129   :  { %916 = vmatpush.msra.mxu1 %v2309_v8  ;;  %967 = vmatpush.msra.mxu2 %v3175_v22  ;;  %v3176_v46 = vld [vmem:[#allocation16_spill] sm:$0xff]  ;;  %v2550_v25 = vand.u32 4294901760, %v340_v37 }
 0x12a   :  { %1020 = vmatpush.msra.mxu3 %v2277_v13  ;;  %664 = vmatmul.f32.vlgmr.msrb.gmra.mxu0 %v2476_v45  ;;  %v3177_v23 = vand.u32 4294901760, %v3176_v46  ;;  %v336_v13 = vld [vmem:[#allocation7 + $0x170] sm:$0xff] }
 0x12b   :  { %861 = vmatpush.msra.mxu0 %v2289_v57  ;;  %918 = vmatpush.msra.mxu1 %v2314_v61  ;;  %v3178_v57 = vand.u32 4294901760, %v2333_v51  ;;  %v2570_v19 = vsub.f32 %v340_v37, %v2550_v25  ;;  %v2665_v37 = vsub.f32 %v312_v1, %v2643_v48 }
 0x12c   :  { %971 = vmatpush.msra.mxu2 %v3177_v23  ;;  %1022 = vmatpush.msra.mxu3 %v2291_v59  ;;  %v3179_v59 = vand.u32 4294901760, %v2340_v35  ;;  %v1132_v23 = vsub.f32 %v2625_v28, %v3125_v6 }
 0x12d   :  { %864 = vmatpush.msra.mxu0 %v2294_v7  ;;  %920 = vmatpush.msra.mxu1 %v2316_v26  ;;  %v3134_v7 = vand.u32 4294901760, %v2538_v16 }
 0x12e   :  { %975 = vmatpush.msra.mxu2 %v3178_v57  ;;  %1024 = vmatpush.msra.mxu3 %v2309_v8  ;;  %v2561_v8 = vand.u32 4294901760, %v336_v13 }
 0x12f   :  { %867 = vmatpush.msra.mxu0 %v2312_v47  ;;  %922 = vmatpush.msra.mxu1 %v2335_v62  ;;  %v328_v47 = vld [vmem:[#allocation7 + $0x130] sm:$0xff] }
 0x130   :  { %979 = vmatpush.msra.mxu2 %v3179_v59  ;;  %1026 = vmatpush.msra.mxu3 %v2314_v61  ;;  %v3133_v61 = vand.u32 4294901760, %v2548_v58  ;;  %v2584_v32 = vsub.f32 %v336_v13, %v2561_v8  ;;  %v296_v13 = vld [vmem:[#allocation7 + $0x30] sm:$0xff] }
 0x131   :  { %870 = vmatpush.msra.mxu0 %v3176_v46  ;;  %924 = vmatpush.msra.mxu1 %v2361_v4  ;;  %v2667_v46 = vand.u32 4294901760, %v304_v52 }
 0x132   :  { %983 = vmatpush.msra.mxu2 %v808_v41  ;;  %1028 = vmatpush.msra.mxu3 %v2316_v26  ;;  %v1090_v26 = vsub.f32 %v2538_v16, %v3134_v7  ;;  %v3132_v41 = vand.u32 4294901760, %v2559_v39  ;;  %v3129_v63 = vand.u32 4294901760, %v2584_v32  ;;  %v313_v7 = vld [vmem:[#allocation7 + $0xb8] sm:$0xff] }
 0x133   :  { %873 = vmatpush.msra.mxu0 %v2333_v51  ;;  %926 = vmatpush.msra.mxu1 %v2373_v50  ;;  %v2586_v51 = vand.u32 4294901760, %v328_v47 }
 0x134   :  { %987 = vmatpush.msra.mxu2 %v814_v56  ;;  %1030 = vmatpush.msra.mxu3 %v2335_v62  ;;  %v1096_v62 = vsub.f32 %v2548_v58, %v3133_v61  ;;  %v3130_v56 = vand.u32 4294901760, %v2570_v19  ;;  %v309_v61 = vld [vmem:[#allocation7 + $0x98] sm:$0xff] }
 0x135   :  { %876 = vmatpush.msra.mxu0 %v2340_v35  ;;  %928 = vmatpush.msra.mxu1 %v2384_v5  ;;  %v2602_v35 = vsub.f32 %v332_v60, %v2574_v53  ;;  %v2612_v24 = vsub.f32 %v328_v47, %v2586_v51  ;;  %v2677_v60 = vsub.f32 %v308_v2, %v2655_v21 }
 0x136   :  { %991 = vmatpush.msra.mxu2 %v820_v43  ;;  %1032 = vmatpush.msra.mxu3 %v2361_v4  ;;  %v1091_v4 = vand.u32 4294901760, %v1090_v26  ;;  %v1102_v43 = vsub.f32 %v2559_v39, %v3132_v41 }
 0x137   :  { %879 = vmatpush.msra.mxu0 %v2369_v27  ;;  %930 = vmatpush.msra.mxu1 %v2389_v0  ;;  %v316_v27 = vld [vmem:[#allocation7 + $0xd0] sm:$0xff]  ;;  %v3126_v31 = vand.u32 4294901760, %v2612_v24 }
 0x138   :  { %995 = vmatpush.msra.mxu2 %v826_v34  ;;  %1034 = vmatpush.msra.mxu3 %v2373_v50  ;;  %v1097_v50 = vand.u32 4294901760, %v1096_v62  ;;  %v1108_v34 = vsub.f32 %v2570_v19, %v3130_v56  ;;  %v2630_v20 = vand.u32 4294901760, %v316_v27  ;;  %v3122_v62 = vand.u32 4294901760, %v2665_v37 }
 0x139   :  { %882 = vmatpush.msra.mxu0 %v2376_v30  ;;  %932 = vmatpush.msra.mxu1 %v2396_v38  ;;  %v3128_v30 = vand.u32 4294901760, %v2602_v35  ;;  %v1126_v29 = vsub.f32 %v2612_v24, %v3126_v31 }
 0x13a   :  { %999 = vmatpush.msra.mxu2 %v832_v40  ;;  %1036 = vmatpush.msra.mxu3 %v2384_v5  ;;  %v1103_v5 = vand.u32 4294901760, %v1102_v43  ;;  %v1114_v40 = vsub.f32 %v2584_v32, %v3129_v63  ;;  %v2653_v17 = vsub.f32 %v316_v27, %v2630_v20  ;;  %v3121_v27 = vand.u32 4294901760, %v2677_v60 }
 0x13b   :  { %936 = vmatmul.f32.vlgmr.msra.gmra.mxu1 %v2485_v44  ;;  %885 = vmatpush.msra.mxu0 %v2387_v11  ;;  %v2641_v11 = vsub.f32 %v320_v10, %v2616_v15  ;;  %v2689_v10 = vsub.f32 %v304_v52, %v2667_v46 }
 0x13c   :  { %1092 = vmatpush.msrb.mxu1 %v1091_v4  ;;  %1003 = vmatpush.msra.mxu2 %v838_v14  ;;  %v1109_v14 = vand.u32 4294901760, %v1108_v34  ;;  %v1115_v22 = vand.u32 4294901760, %v1114_v40  ;;  %v3123_v59 = vand.u32 4294901760, %v2653_v17  ;;  %v2691_v4 = vand.u32 4294901760, %v296_v13 }
 0x13d   :  { %1038 = vmatpush.msra.mxu3 %v2389_v0  ;;  %1005 = vmatmul.f32.vlgmr.msra.gmra.mxu2 %v2476_v45  ;;  %v1120_v0 = vsub.f32 %v2602_v35, %v3128_v30  ;;  %v2703_v34 = vand.u32 4294901760, %v292_v54  ;;  %v3119_v40 = vand.u32 4294901760, %v2689_v10  ;;  %v1156_v52 = vsub.f32 %v2677_v60, %v3121_v27 }
 0x13e   :  { %1098 = vmatpush.msrb.mxu1 %v1097_v50  ;;  %1190 = vmatpush.msrb.mxu2 %v2538_v16  ;;  %v1144_v43 = vsub.f32 %v2653_v17, %v3123_v59  ;;  %v2713_v2 = vsub.f32 %v296_v13, %v2691_v4  ;;  %v329_v59 = vld [vmem:[#allocation7 + $0x138] sm:$0xff] }
 0x13f   :  { %888 = vmatpush.msra.mxu0 %v2405_v55  ;;  %1040 = vmatpush.msra.mxu3 %v2396_v38  ;;  %v300_v55 = vld [vmem:[#allocation7 + $0x50] sm:$0xff]  ;;  %v3124_v38 = vand.u32 4294901760, %v2641_v11  ;;  %v1121_v57 = vand.u32 4294901760, %v1120_v0  ;;  %v2798_v31 = vand.u32 4294901760, %v329_v59 }
 0x140   :  { %1042 = vmatmul.f32.vlgmr.msra.gmra.mxu3 %v2476_v45  ;;  %1104 = vmatpush.msrb.mxu1 %v1103_v5  ;;  %v2679_v47 = vand.u32 4294901760, %v300_v55  ;;  %v1150_v5 = vsub.f32 %v2665_v37, %v3122_v62  ;;  %v3118_v13 = vand.u32 4294901760, %v2713_v2 }
 0x141   :  { %1193 = vmatpush.msrb.mxu2 %v2548_v58  ;;  %1243 = vmatpush.msrb.mxu3 %v2523_v9  ;;  %v1138_v26 = vsub.f32 %v2641_v11, %v3124_v38  ;;  %v325_v38 = vld [vmem:[#allocation7 + $0x118] sm:$0xff] }
 0x142   :  { %891 = vmatpush.msra.mxu0 %v2408_v18  ;;  %1110 = vmatpush.msrb.mxu1 %v1109_v14  ;;  %v1127_v18 = vand.u32 4294901760, %v1126_v29  ;;  %v2701_v50 = vsub.f32 %v300_v55, %v2679_v47  ;;  %v1145_v14 = vand.u32 4294901760, %v1144_v43  ;;  %v353_v29 = vld [vmem:[#allocation7 + $0x1f8] sm:$0xff]  ;;  %v1151_v55 = vand.u32 4294901760, %v1150_v5 }
 0x143   :  { %1196 = vmatpush.msrb.mxu2 %v2559_v39  ;;  %1245 = vmatpush.msrb.mxu3 %v2530_v42  ;;  %v1139_v1 = vand.u32 4294901760, %v1138_v26  ;;  %v2811_v30 = vand.u32 4294901760, %v325_v38 }
 0x144   :  { %894 = vmatpush.msra.mxu0 %v2413_v49  ;;  %1116 = vmatpush.msrb.mxu1 %v1115_v22  ;;  %v1133_v49 = vand.u32 4294901760, %v1132_v23  ;;  %v3117_v0 = vand.u32 4294901760, %v2701_v50  ;;  %v2723_v22 = vsub.f32 %v292_v54, %v2703_v34  ;;  %v1162_v23 = vsub.f32 %v2689_v10, %v3119_v40  ;;  %v337_v40 = vld [vmem:[#allocation7 + $0x178] sm:$0xff] }
 0x145   :  { %897 = vmatmul.f32.vlgmr.msra.gmra.mxu0 %v2480_v33  ;;  %1199 = vmatpush.msrb.mxu2 %v2570_v19 }
 0x146   :  { %1047 = vmatpush.msrb.mxu0 %v2523_v9  ;;  %1247 = vmatpush.msrb.mxu3 %v2540_v36  ;;  %v1168_v54 = vsub.f32 %v2701_v50, %v3117_v0  ;;  %v3120_v26 = vand.u32 4294901760, %v2723_v22  ;;  %v1163_v43 = vand.u32 4294901760, %v1162_v23  ;;  %v341_v0 = vld [vmem:[#allocation7 + $0x198] sm:$0xff] }
 0x147   :  { %1122 = vmatpush.msrb.mxu1 %v1121_v57  ;;  %1202 = vmatpush.msrb.mxu2 %v2584_v32  ;;  %v349_v57 = vld [vmem:[#allocation7 + $0x1d8] sm:$0xff] }
 0x148   :  { %1049 = vmatpush.msrb.mxu0 %v2530_v42  ;;  %1249 = vmatpush.msrb.mxu3 %v2550_v25  ;;  %v2747_v5 = vand.u32 4294901760, %v349_v57 }
 0x149   :  { %1128 = vmatpush.msrb.mxu1 %v1127_v18  ;;  %1205 = vmatpush.msrb.mxu2 %v2602_v35  ;;  %v1157_v18 = vand.u32 4294901760, %v1156_v52  ;;  %v1169_v52 = vand.u32 4294901760, %v1168_v54 }
 0x14a   :  { %1051 = vmatpush.msrb.mxu0 %v2540_v36  ;;  %1251 = vmatpush.msrb.mxu3 %v2561_v8  ;;  %v2764_v54 = vsub.f32 %v349_v57, %v2747_v5 }
 0x14b   :  { %1134 = vmatpush.msrb.mxu1 %v1133_v49  ;;  %1208 = vmatpush.msrb.mxu2 %v2612_v24  ;;  %v2739_v49 = vand.u32 4294901760, %v353_v29 }
 0x14c   :  { %1053 = vmatpush.msrb.mxu0 %v2550_v25  ;;  %1253 = vmatpush.msrb.mxu3 %v2574_v53 }
 0x14d   :  { %1140 = vmatpush.msrb.mxu1 %v1139_v1  ;;  %1211 = vmatpush.msrb.mxu2 %v2625_v28  ;;  %v1174_v1 = vsub.f32 %v2713_v2, %v3118_v13  ;;  %v2756_v23 = vsub.f32 %v353_v29, %v2739_v49  ;;  %v2768_v29 = vand.u32 4294901760, %v341_v0 }
 0x14e   :  { %1055 = vmatpush.msrb.mxu0 %v2561_v8  ;;  %1255 = vmatpush.msrb.mxu3 %v2586_v51 }
 0x14f   :  { %1146 = vmatpush.msrb.mxu1 %v1145_v14  ;;  %1214 = vmatpush.msrb.mxu2 %v2641_v11  ;;  %v345_v14 = vld [vmem:[#allocation7 + $0x1b8] sm:$0xff]  ;;  %v3127_v62 = vand.u32 4294901760, %v2756_v23 }
 0x150   :  { %1057 = vmatpush.msrb.mxu0 %v2574_v53  ;;  %1257 = vmatpush.msrb.mxu3 %v2597_v3  ;;  %v2760_v13 = vand.u32 4294901760, %v345_v14 }
 0x151   :  { %1152 = vmatpush.msrb.mxu1 %v1151_v55  ;;  %1217 = vmatpush.msrb.mxu2 %v2653_v17  ;;  %v1180_v55 = vsub.f32 %v2723_v22, %v3120_v26  ;;  %v333_v26 = vld [vmem:[#allocation7 + $0x158] sm:$0xff] }
 0x152   :  { %1059 = vmatpush.msrb.mxu0 %v2586_v51  ;;  %1259 = vmatpush.msrb.mxu3 %v2616_v15  ;;  %v2777_v57 = vsub.f32 %v345_v14, %v2760_v13  ;;  %v1431_v14 = vsub.f32 %v2756_v23, %v3127_v62 }
 0x153   :  { %1158 = vmatpush.msrb.mxu1 %v1157_v18  ;;  %1220 = vmatpush.msrb.mxu2 %v2665_v37  ;;  %v1175_v18 = vand.u32 4294901760, %v1174_v1  ;;  %v1181_v27 = vand.u32 4294901760, %v1180_v55  ;;  %v3131_v1 = vand.u32 4294901760, %v2764_v54  ;;  %v2786_v55 = vsub.f32 %v341_v0, %v2768_v29  ;;  %v321_v0 = vld [vmem:[#allocation7 + $0xf8] sm:$0xff] }
 0x154   :  { %1061 = vmatpush.msrb.mxu0 %v2597_v3  ;;  %1261 = vmatpush.msrb.mxu3 %v2630_v20  ;;  %v3135_v6 = vand.u32 4294901760, %v2777_v57  ;;  %v1432_v63 = vand.u32 4294901760, %v1431_v14  ;;  %v2824_v41 = vand.u32 4294901760, %v321_v0 }
 0x155   :  { %1164 = vmatpush.msrb.mxu1 %v1163_v43  ;;  %1223 = vmatpush.msrb.mxu2 %v2677_v60  ;;  %v2772_v43 = vand.u32 4294901760, %v337_v40  ;;  %v3136_v62 = vand.u32 4294901760, %v2786_v55 }
 0x156   :  { %1063 = vmatpush.msrb.mxu0 %v2616_v15  ;;  %1263 = vmatpush.msrb.mxu3 %v2643_v48 }
 0x157   :  { %1170 = vmatpush.msrb.mxu1 %v1169_v52  ;;  %1226 = vmatpush.msrb.mxu2 %v2689_v10  ;;  %v2781_v52 = vand.u32 4294901760, %v333_v26 }
 0x158   :  { %1065 = vmatpush.msrb.mxu0 %v2630_v20  ;;  %1265 = vmatpush.msrb.mxu3 %v2655_v21 }
 0x159   :  { %1176 = vmatpush.msrb.mxu1 %v1175_v18  ;;  %1229 = vmatpush.msrb.mxu2 %v2701_v50  ;;  %v2793_v18 = vsub.f32 %v337_v40, %v2772_v43  ;;  %v2806_v40 = vsub.f32 %v333_v26, %v2781_v52  ;;  %v2822_v26 = vsub.f32 %v329_v59, %v2798_v31 }
 0x15a   :  { %1067 = vmatpush.msrb.mxu0 %v2643_v48  ;;  %1267 = vmatpush.msrb.mxu3 %v2667_v46  ;;  %v2835_v59 = vsub.f32 %v325_v38, %v2811_v30  ;;  %v2847_v38 = vsub.f32 %v321_v0, %v2824_v41 }
 0x15b   :  { %1182 = vmatpush.msrb.mxu1 %v1181_v27  ;;  %1232 = vmatpush.msrb.mxu2 %v2713_v2  ;;  %3180 = vst [vmem:[#allocation15_spill] sm:$0xff] %v2793_v18  ;;  %v1437_v27 = vsub.f32 %v2764_v54, %v3131_v1  ;;  %v3138_v56 = vand.u32 4294901760, %v2793_v18  ;;  %v317_v1 = vld [vmem:[#allocation7 + $0xd8] sm:$0xff] }
 0x15c   :  { %1069 = vmatpush.msrb.mxu0 %v2655_v21  ;;  %1269 = vmatpush.msrb.mxu3 %v2679_v47  ;;  %3181 = vst [vmem:[#allocation16_spill] sm:$0xff] %v2806_v40 }
 0x15d   :  { %1184 = vmatmul.f32.vlgmr.msrb.gmra.mxu1 %v2476_v45  ;;  %1235 = vmatpush.msrb.mxu2 %v2723_v22  ;;  %3182 = vst [vmem:[#allocation19_spill] sm:$0xff] %v2822_v26  ;;  %v1438_v14 = vand.u32 4294901760, %v1437_v27  ;;  %v1455_v27 = vsub.f32 %v2793_v18, %v3138_v56  ;;  %v301_v18 = vld [vmem:[#allocation7 + $0x58] sm:$0xff] }
 0x15e   :  { %1351 = vmatpush.msra.mxu1 %v2523_v9  ;;  %1071 = vmatpush.msrb.mxu0 %v2667_v46  ;;  %v1443_v9 = vsub.f32 %v2777_v57, %v3135_v6  ;;  %v2837_v6 = vand.u32 4294901760, %v317_v1 }
 0x15f   :  { %1271 = vmatpush.msrb.mxu3 %v2691_v4  ;;  %1238 = vmatmul.f32.vlgmr.msrb.gmra.mxu2 %v2480_v33  ;;  %v2849_v33 = vand.u32 4294901760, %v313_v7 }
 0x160   :  { %1353 = vmatpush.msra.mxu1 %v2530_v42  ;;  %1388 = vmatpush.msra.mxu2 %v2739_v49  ;;  %v1449_v42 = vsub.f32 %v2786_v55, %v3136_v62  ;;  %v2859_v0 = vsub.f32 %v317_v1, %v2837_v6  ;;  %v2861_v62 = vand.u32 4294901760, %v309_v61 }
 0x161   :  { %1073 = vmatpush.msrb.mxu0 %v2679_v47  ;;  %1273 = vmatpush.msrb.mxu3 %v2703_v34  ;;  %v2872_v1 = vsub.f32 %v313_v7, %v2849_v33 }
 0x162   :  { %1277 = vmatmul.f32.vlgmr.msrb.gmra.mxu3 %v2485_v44  ;;  %1355 = vmatpush.msra.mxu1 %v2540_v36  ;;  %v1444_v36 = vand.u32 4294901760, %v1443_v9  ;;  %v305_v44 = vld [vmem:[#allocation7 + $0x78] sm:$0xff]  ;;  %v2885_v7 = vsub.f32 %v309_v61, %v2861_v62  ;;  %v2887_v9 = vand.u32 4294901760, %v301_v18 }
 0x163   :  { %1390 = vmatpush.msra.mxu2 %v2747_v5  ;;  %1433 = vmatpush.msra.mxu3 %v1432_v63  ;;  %v3183_v63 = vand.u32 4294901760, %v2806_v40 }
 0x164   :  { %1075 = vmatpush.msrb.mxu0 %v2691_v4  ;;  %1357 = vmatpush.msra.mxu1 %v2550_v25  ;;  %v1450_v25 = vand.u32 4294901760, %v1449_v42 }
 0x165   :  { %1392 = vmatpush.msra.mxu2 %v2760_v13  ;;  %1439 = vmatpush.msra.mxu3 %v1438_v14  ;;  %v1461_v56 = vsub.f32 %v2806_v40, %v3183_v63  ;;  %v1456_v14 = vand.u32 4294901760, %v1455_v27  ;;  %v3184_v63 = vand.u32 4294901760, %v2538_v16  ;;  %v2874_v40 = vand.u32 4294901760, %v305_v44 }
 0x166   :  { %1077 = vmatpush.msrb.mxu0 %v2703_v34  ;;  %1359 = vmatpush.msra.mxu1 %v2561_v8  ;;  %v3185_v8 = vand.u32 4294901760, %v2822_v26  ;;  %v3186_v16 = vand.u32 4294901760, %v2548_v58  ;;  %v3188_v58 = vand.u32 4294901760, %v2559_v39  ;;  %v3190_v39 = vand.u32 4294901760, %v2570_v19 }
 0x167   :  { %1083 = vmatmul.f32.vlgmr.msrb.gmra.mxu0 %v2497_v12  ;;  %1394 = vmatpush.msra.mxu2 %v2768_v29  ;;  %v1462_v27 = vand.u32 4294901760, %v1461_v56  ;;  %v3189_v56 = vand.u32 4294901760, %v2847_v38  ;;  %v2898_v61 = vsub.f32 %v305_v44, %v2874_v40  ;;  %v2911_v44 = vsub.f32 %v301_v18, %v2887_v9 }
 0x168   :  { %1284 = vmatpush.msra.mxu0 %v3184_v63  ;;  %1445 = vmatpush.msra.mxu3 %v1444_v36  ;;  %v1467_v42 = vsub.f32 %v2822_v26, %v3185_v8  ;;  %v3187_v36 = vand.u32 4294901760, %v2835_v59  ;;  %v1484_v8 = vand.u32 4294901760, %v2859_v0  ;;  %v297_v26 = vld [vmem:[#allocation7 + $0x38] sm:$0xff]  ;;  %v3191_v19 = vand.u32 4294901760, %v2584_v32 }
 0x169   :  { %1361 = vmatpush.msra.mxu1 %v2574_v53  ;;  %1396 = vmatpush.msra.mxu2 %v2772_v43  ;;  %v3192_v18 = vand.u32 4294901760, %v2602_v35 }
 0x16a   :  { %1288 = vmatpush.msra.mxu0 %v3186_v16  ;;  %1451 = vmatpush.msra.mxu3 %v1450_v25  ;;  %v1473_v63 = vsub.f32 %v2835_v59, %v3187_v36  ;;  %v1468_v53 = vand.u32 4294901760, %v1467_v42  ;;  %v1479_v25 = vsub.f32 %v2847_v38, %v3189_v56  ;;  %v1490_v16 = vand.u32 4294901760, %v2872_v1  ;;  %v293_v36 = vld [vmem:[#allocation7 + $0x18] sm:$0xff] }
 0x16b   :  { %1363 = vmatpush.msra.mxu1 %v2586_v51  ;;  %1398 = vmatpush.msra.mxu2 %v2781_v52  ;;  %v2902_v51 = vand.u32 4294901760, %v297_v26  ;;  %v1485_v42 = vsub.f32 %v2859_v0, %v1484_v8  ;;  %v1502_v56 = vand.u32 4294901760, %v2898_v61 }
 0x16c   :  { %1292 = vmatpush.msra.mxu0 %v3188_v58  ;;  %1457 = vmatpush.msra.mxu3 %v1456_v14  ;;  %v1474_v14 = vand.u32 4294901760, %v1473_v63  ;;  %v1496_v58 = vand.u32 4294901760, %v2885_v7  ;;  %v1491_v63 = vsub.f32 %v2872_v1, %v1490_v16 }
 0x16d   :  { %1365 = vmatpush.msra.mxu1 %v2597_v3  ;;  %1400 = vmatpush.msra.mxu2 %v2798_v31  ;;  %v2915_v3 = vand.u32 4294901760, %v293_v36  ;;  %v1486_v32 = vand.u32 4294901760, %v1485_v42 }
 0x16e   :  { %1296 = vmatpush.msra.mxu0 %v3190_v39  ;;  %1463 = vmatpush.msra.mxu3 %v1462_v27  ;;  %v1480_v27 = vand.u32 4294901760, %v1479_v25  ;;  %v1508_v25 = vand.u32 4294901760, %v2911_v44  ;;  %v1492_v35 = vand.u32 4294901760, %v1491_v63  ;;  %v1503_v39 = vsub.f32 %v2898_v61, %v1502_v56 }
 0x16f   :  { %1367 = vmatpush.msra.mxu1 %v2616_v15  ;;  %1402 = vmatpush.msra.mxu2 %v2811_v30  ;;  %v2926_v15 = vsub.f32 %v297_v26, %v2902_v51  ;;  %v3193_v26 = vand.u32 4294901760, %v2612_v24  ;;  %v3198_v63 = vand.u32 4294901760, %v2677_v60  ;;  %v3201_v60 = vand.u32 4294901760, %v2701_v50 }
 0x170   :  { %1300 = vmatpush.msra.mxu0 %v3191_v19  ;;  %1469 = vmatpush.msra.mxu3 %v1468_v53  ;;  %v1497_v53 = vsub.f32 %v2885_v7, %v1496_v58  ;;  %v1509_v24 = vsub.f32 %v2911_v44, %v1508_v25  ;;  %v1504_v19 = vand.u32 4294901760, %v1503_v39  ;;  %v3205_v50 = vand.u32 4294901760, %v2723_v22  ;;  %v3209_v22 = vld [vmem:[#allocation16_spill] sm:$0xff] }
 0x171   :  { %1369 = vmatpush.msra.mxu1 %v2630_v20  ;;  %1404 = vmatpush.msra.mxu2 %v2824_v41  ;;  %v2937_v20 = vsub.f32 %v293_v36, %v2915_v3 }
 0x172   :  { %1304 = vmatpush.msra.mxu0 %v3192_v18  ;;  %1475 = vmatpush.msra.mxu3 %v1474_v14  ;;  %v3194_v14 = vand.u32 4294901760, %v2625_v28  ;;  %v1498_v36 = vand.u32 4294901760, %v1497_v53  ;;  %v3202_v18 = vand.u32 4294901760, %v2764_v54 }
 0x173   :  { %1371 = vmatpush.msra.mxu1 %v2643_v48  ;;  %1406 = vmatpush.msra.mxu2 %v2837_v6  ;;  %v1514_v48 = vand.u32 4294901760, %v2926_v15  ;;  %v1520_v42 = vand.u32 4294901760, %v2937_v20 }
 0x174   :  { %1308 = vmatpush.msra.mxu0 %v3193_v26  ;;  %1481 = vmatpush.msra.mxu3 %v1480_v27  ;;  %v3196_v27 = vand.u32 4294901760, %v2653_v17 }
 0x175   :  { %1373 = vmatpush.msra.mxu1 %v2655_v21  ;;  %1408 = vmatpush.msra.mxu2 %v2849_v33  ;;  %v3195_v21 = vand.u32 4294901760, %v2641_v11  ;;  %v1515_v28 = vsub.f32 %v2926_v15, %v1514_v48  ;;  %v1521_v11 = vsub.f32 %v2937_v20, %v1520_v42 }
 0x176   :  { %1312 = vmatpush.msra.mxu0 %v3194_v14  ;;  %1487 = vmatpush.msra.mxu3 %v1486_v32  ;;  %v3206_v32 = vand.u32 4294901760, %v2786_v55 }
 0x177   :  { %1375 = vmatpush.msra.mxu1 %v2667_v46  ;;  %1410 = vmatpush.msra.mxu2 %v2861_v62  ;;  %v1510_v46 = vand.u32 4294901760, %v1509_v24  ;;  %v1516_v17 = vand.u32 4294901760, %v1515_v28 }
 0x178   :  { %1316 = vmatpush.msra.mxu0 %v3195_v21  ;;  %1493 = vmatpush.msra.mxu3 %v1492_v35 }
 0x179   :  { %1377 = vmatpush.msra.mxu1 %v2679_v47  ;;  %1412 = vmatpush.msra.mxu2 %v2874_v40  ;;  %v3197_v47 = vand.u32 4294901760, %v2665_v37  ;;  %v3199_v37 = vand.u32 4294901760, %v2689_v10  ;;  %v3204_v10 = vand.u32 4294901760, %v2777_v57 }
 0x17a   :  { %1320 = vmatpush.msra.mxu0 %v3196_v27  ;;  %1499 = vmatpush.msra.mxu3 %v1498_v36 }
 0x17b   :  { %1379 = vmatpush.msra.mxu1 %v2691_v4  ;;  %1414 = vmatpush.msra.mxu2 %v2887_v9  ;;  %v1522_v4 = vand.u32 4294901760, %v1521_v11 }
 0x17c   :  { %1324 = vmatpush.msra.mxu0 %v3197_v47  ;;  %1505 = vmatpush.msra.mxu3 %v1504_v19 }
 0x17d   :  { %1381 = vmatpush.msra.mxu1 %v2703_v34  ;;  %1416 = vmatpush.msra.mxu2 %v2902_v51  ;;  %v3200_v34 = vand.u32 4294901760, %v2756_v23 }
 0x17e   :  { %1328 = vmatpush.msra.mxu0 %v3198_v63  ;;  %1511 = vmatpush.msra.mxu3 %v1510_v46 }
 0x17f   :  { %1383 = vmatmul.f32.vlgmr.msra.gmra.mxu1 %v2476_v45  ;;  %1418 = vmatpush.msra.mxu2 %v2915_v3 }
 0x180   :  { %1584 = vmatpush.msrb.mxu1 %v2739_v49  ;;  %1332 = vmatpush.msra.mxu0 %v3199_v37 }
 0x181   :  { %1517 = vmatpush.msra.mxu3 %v1516_v17  ;;  %1424 = vmatmul.f32.vlgmr.msra.gmra.mxu2 %v2497_v12  ;;  %v3203_v12 = vand.u32 4294901760, %v2713_v2  ;;  %v3207_v2 = vld [vmem:[#allocation15_spill] sm:$0xff] }
 0x182   :  { %1586 = vmatpush.msrb.mxu1 %v2747_v5  ;;  %1625 = vmatpush.msrb.mxu2 %v3200_v34 }
 0x183   :  { %1336 = vmatpush.msra.mxu0 %v3201_v60  ;;  %1523 = vmatpush.msra.mxu3 %v1522_v4 }
 0x184   :  { %1525 = vmatmul.f32.vlgmr.msra.gmra.mxu3 %v2476_v45  ;;  %1588 = vmatpush.msrb.mxu1 %v2760_v13 }
 0x185   :  { %1629 = vmatpush.msrb.mxu2 %v3202_v18  ;;  %1692 = vmatpush.msrb.mxu3 %v2739_v49  ;;  %v3208_v49 = vand.u32 4294901760, %v3207_v2 }
 0x186   :  { %1340 = vmatpush.msra.mxu0 %v3203_v12  ;;  %1590 = vmatpush.msrb.mxu1 %v2768_v29 }
 0x187   :  { %1633 = vmatpush.msrb.mxu2 %v3204_v10  ;;  %1694 = vmatpush.msrb.mxu3 %v2747_v5  ;;  %v3210_v5 = vand.u32 4294901760, %v3209_v22 }
 0x188   :  { %1344 = vmatpush.msra.mxu0 %v3205_v50  ;;  %1592 = vmatpush.msrb.mxu1 %v2772_v43 }
 0x189   :  { %1346 = vmatmul.f32.vlgmr.msra.gmra.mxu0 %v2476_v45  ;;  %1637 = vmatpush.msrb.mxu2 %v3206_v32 }
 0x18a   :  { %1531 = vmatpush.msrb.mxu0 %v2756_v23  ;;  %1696 = vmatpush.msrb.mxu3 %v2760_v13  ;;  %v3211_v13 = vld [vmem:[#allocation19_spill] sm:$0xff] }
 0x18b   :  { %1594 = vmatpush.msrb.mxu1 %v2781_v52  ;;  %1641 = vmatpush.msrb.mxu2 %v3208_v49  ;;  %v3212_v23 = vand.u32 4294901760, %v3211_v13 }
 0x18c   :  { %1534 = vmatpush.msrb.mxu0 %v2764_v54  ;;  %1698 = vmatpush.msrb.mxu3 %v2768_v29  ;;  %v3213_v54 = vand.u32 4294901760, %v2835_v59  ;;  %v3214_v29 = vand.u32 4294901760, %v2847_v38 }
 0x18d   :  { %1596 = vmatpush.msrb.mxu1 %v2798_v31  ;;  %1645 = vmatpush.msrb.mxu2 %v3210_v5 }
 0x18e   :  { %1537 = vmatpush.msrb.mxu0 %v2777_v57  ;;  %1700 = vmatpush.msrb.mxu3 %v2772_v43  ;;  %v3215_v43 = vld [vmem:[#allocation18_spill] sm:$0xff] }
 0x18f   :  { %1598 = vmatpush.msrb.mxu1 %v2811_v30  ;;  %1649 = vmatpush.msrb.mxu2 %v3212_v23 }
 0x190   :  { %1540 = vmatpush.msrb.mxu0 %v2786_v55  ;;  %1702 = vmatpush.msrb.mxu3 %v2781_v52 }
 0x191   :  { %1600 = vmatpush.msrb.mxu1 %v2824_v41  ;;  %1653 = vmatpush.msrb.mxu2 %v3213_v54 }
 0x192   :  { %1543 = vmatpush.msrb.mxu0 %v3207_v2  ;;  %1704 = vmatpush.msrb.mxu3 %v2798_v31  ;;  %v3038_v31 = vld [vmem:[#allocation8] sm:$0xf] }
 0x193   :  { %1602 = vmatpush.msrb.mxu1 %v2837_v6  ;;  %1657 = vmatpush.msrb.mxu2 %v3214_v29  ;;  %v359_v46 = vperm.slane %v3038_v31, 3 }
 0x194   :  { %1546 = vmatpush.msrb.mxu0 %v3209_v22  ;;  %1706 = vmatpush.msrb.mxu3 %v2811_v30 }
 0x195   :  { %1604 = vmatpush.msrb.mxu1 %v2849_v33  ;;  %1661 = vmatpush.msrb.mxu2 %v1484_v8  ;;  %v357_v8 = vperm.slane %v3038_v31, 1 }
 0x196   :  { %1549 = vmatpush.msrb.mxu0 %v3211_v13  ;;  %1708 = vmatpush.msrb.mxu3 %v2824_v41  ;;  %v356_v41 = vperm.slane %v3038_v31, 0 }
 0x197   :  { %1606 = vmatpush.msrb.mxu1 %v2861_v62  ;;  %1665 = vmatpush.msrb.mxu2 %v1490_v16 }
 0x198   :  { %1552 = vmatpush.msrb.mxu0 %v2835_v59  ;;  %1710 = vmatpush.msrb.mxu3 %v2837_v6  ;;  %v503_v6 = vpop.f32.mrf.mxu1 }
 0x199   :  { %1608 = vmatpush.msrb.mxu1 %v2874_v40  ;;  %1669 = vmatpush.msrb.mxu2 %v1496_v58 }
 0x19a   :  { %1555 = vmatpush.msrb.mxu0 %v2847_v38  ;;  %1712 = vmatpush.msrb.mxu3 %v2849_v33 }
 0x19b   :  { %1610 = vmatpush.msrb.mxu1 %v2887_v9  ;;  %1673 = vmatpush.msrb.mxu2 %v1502_v56 }
 0x19c   :  { %1558 = vmatpush.msrb.mxu0 %v2859_v0  ;;  %1714 = vmatpush.msrb.mxu3 %v2861_v62 }
 0x19d   :  { %1612 = vmatpush.msrb.mxu1 %v2902_v51  ;;  %1677 = vmatpush.msrb.mxu2 %v1508_v25  ;;  %v402_v30 = vpop.f32.mrf.mxu0  ;;  %v557_v57 = vpop.f32.mrf.mxu2 }
 0x19e   :  { %1561 = vmatpush.msrb.mxu0 %v2872_v1  ;;  %1716 = vmatpush.msrb.mxu3 %v2874_v40  ;;  %v403_v33 = vadd.f32 %v402_v30, %v356_v41 }
 0x19f   :  { %1614 = vmatpush.msrb.mxu1 %v2915_v3  ;;  %1681 = vmatpush.msrb.mxu2 %v1514_v48  ;;  %v596_v55 = vpop.f32.mrf.mxu3 }
 0x1a0   :  { %1564 = vmatpush.msrb.mxu0 %v2885_v7  ;;  %1718 = vmatpush.msrb.mxu3 %v2887_v9  ;;  %v504_v62 = vadd.f32 %v503_v6, %v403_v33  ;;  %v3216_v9 = vld [vmem:[#allocation17_spill] sm:$0xff]  ;;  %v702_v0 = vpop.f32.mrf.mxu1 }
 0x1a1   :  { %1618 = vmatmul.f32.vlgmr.msrb.gmra.mxu1 %v3215_v43  ;;  %1685 = vmatpush.msrb.mxu2 %v1520_v42 }
 0x1a2   :  { %1567 = vmatpush.msrb.mxu0 %v2898_v61  ;;  %1720 = vmatpush.msrb.mxu3 %v2902_v51  ;;  %v558_v52 = vadd.f32 %v557_v57, %v504_v62 }
 0x1a3   :  { %1687 = vmatmul.f32.vlgmr.msrb.gmra.mxu2 %v2476_v45 }
 0x1a4   :  { %1570 = vmatpush.msrb.mxu0 %v2911_v44  ;;  %1722 = vmatpush.msrb.mxu3 %v2915_v3  ;;  %v597_v40 = vadd.f32 %v596_v55, %v558_v52 }
 0x1a5   :  { %1724 = vmatmul.f32.vlgmr.msrb.gmra.mxu3 %v2476_v45 }
 0x1a6   :  { %1573 = vmatpush.msrb.mxu0 %v2926_v15  ;;  %v743_v7 = vpop.f32.mrf.mxu2 }
 0x1a7   :  { %v665_v59 = vpop.f32.mrf.mxu0  ;;  %v744_v16 = vadd.f32 %v743_v7, %v357_v8 }
 0x1a8   :  { %1576 = vmatpush.msrb.mxu0 %v2937_v20  ;;  %v666_v38 = vadd.f32 %v665_v59, %v597_v40  ;;  %v358_v20 = vperm.slane %v3038_v31, 2 }
 0x1a9   :  { %1579 = vmatmul.f32.vlgmr.msrb.gmra.mxu0 %v3216_v9  ;;  %v844_v61 = vpop.f32.mrf.mxu3 }
 0x1aa   :  { %v703_v1 = vadd.f32 %v702_v0, %v666_v38  ;;  %v845_v51 = vadd.f32 %v844_v61, %v744_v16 }
 0x1ac   :  { %1728 = vst [vmem:[#allocation10] sm:$0xff] %v703_v1 }
 0x1b8   :  { %v937_v45 = vpop.f32.mrf.mxu1 }
 0x1c0   :  { %v1006_v56 = vpop.f32.mrf.mxu2 }
 0x1c2   :  { %v898_v58 = vpop.f32.mrf.mxu0 }
 0x1c3   :  { %v899_v44 = vadd.f32 %v898_v58, %v845_v51  ;;  %v1043_v53 = vpop.f32.mrf.mxu3 }
 0x1c5   :  { %v938_v3 = vadd.f32 %v937_v45, %v899_v44 }
 0x1c7   :  { %v1007_v15 = vadd.f32 %v1006_v56, %v938_v3 }
 0x1c9   :  { %v1044_v25 = vadd.f32 %v1043_v53, %v1007_v15 }
 0x1cb   :  { %1729 = vst [vmem:[#allocation10 + $0x8] sm:$0xff] %v1044_v25 }
 0x1da   :  { %v1185_v39 = vpop.f32.mrf.mxu1 }
 0x1e2   :  { %v1239_v14 = vpop.f32.mrf.mxu2 }
 0x1e4   :  { %v1084_v26 = vpop.f32.mrf.mxu0 }
 0x1e5   :  { %v1085_v35 = vadd.f32 %v1084_v26, %v358_v20  ;;  %v1278_v24 = vpop.f32.mrf.mxu3 }
 0x1e7   :  { %v1186_v48 = vadd.f32 %v1185_v39, %v1085_v35 }
 0x1e9   :  { %v1240_v36 = vadd.f32 %v1239_v14, %v1186_v48 }
 0x1eb   :  { %v1279_v42 = vadd.f32 %v1278_v24, %v1240_v36 }
 0x1fc   :  { %v1384_v28 = vpop.f32.mrf.mxu1 }
 0x204   :  { %v1425_v11 = vpop.f32.mrf.mxu2 }
 0x205   :  { %v1426_v47 = vadd.f32 %v1425_v11, %v359_v46 }
 0x206   :  { %v1347_v21 = vpop.f32.mrf.mxu0 }
 0x207   :  { %v1348_v19 = vadd.f32 %v1347_v21, %v1279_v42  ;;  %v1526_v17 = vpop.f32.mrf.mxu3 }
 0x208   :  { %v1527_v63 = vadd.f32 %v1526_v17, %v1426_v47 }
 0x209   :  { %v1385_v27 = vadd.f32 %v1384_v28, %v1348_v19 }
 0x20b   :  { %1730 = vst [vmem:[#allocation10 + $0x10] sm:$0xff] %v1385_v27 }
 0x21e   :  { %v1619_v34 = vpop.f32.mrf.mxu1 }
 0x226   :  { %v1580_v4 = vpop.f32.mrf.mxu0  ;;  %v1688_v18 = vpop.f32.mrf.mxu2 }
 0x227   :  { %v1581_v37 = vadd.f32 %v1580_v4, %v1527_v63 }
 0x228   :  { %v1725_v10 = vpop.f32.mrf.mxu3 }
 0x229   :  { %v1620_v60 = vadd.f32 %v1619_v34, %v1581_v37 }
 0x22b   :  { %v1689_v12 = vadd.f32 %v1688_v18, %v1620_v60 }
 0x22d   :  { %v1726_v50 = vadd.f32 %v1725_v10, %v1689_v12 }
 0x22f   :  { %1731 = vst [vmem:[#allocation10 + $0x18] sm:$0xff] %v1726_v50 }
 0x230   :  { %1742 = dma.vmem_to_hbm [thread:$0]  %s1738_s19, 512, %s1740_s22, [#allocation4]  }
 0x231   :  { %1905 = dma.done.wait [#allocation4], 512  }
 0x232   :  { %1906 = vsyncadd [#allocation4], 4294966784 }
 0x233   :  { %1747 = vsyncpa [#allocation3], 1 }
 0x234   :  { %1748 = vsyncpa [#allocation6], 1 }
 0x235   :  { %1749 = vsyncpa [#allocation9], 1 }
 0x236   :  { %1750 = vsyncpa [#allocation4], 1 }

</bundles_post_ra>
